<compile_context>
chip_gen: v6e
topology: v6e:2x2x1
jax: 0.10.0
libtpu: 0.0.40
codegen_flags: <defaults>
</compile_context>

<pallas_src>
import jax
import jax.numpy as jnp
from jax.experimental import pallas as pl
from jax.experimental.pallas import tpu as pltpu

INPUT_SIZE = 10
HIDDEN_SIZE = 32
NUM_LAYERS = 3
SEQ_LEN = 8
BATCH = 2
BATCH_PAD = 8           # pad batch to a full sublane group
IN_PAD = 16             # pad input features for a tidy packed weight layout


def lstm_kernel(x_ref, w_ref, c_ref, out_ref, gx_ref):
    """Whole forward pass in VMEM.

    x_ref : (T*Bp, IN_PAD) bf16   time-major, batch/feature zero-padded input
    w_ref : (IN_PAD + 3H, 3*4H) bf16  packed weights:
              rows 0:16      -> [W_ih0 | 0 | 0]      (g-cols pre-scaled by 2)
              rows 16:16+3H  -> block-bidiagonal
                   h0-rows: [W_hh0 | W_ih1 |  0   ]
                   h1-rows: [  0   | W_hh1 | W_ih2]
                   h2-rows: [  0   |   0   | W_hh2]
    c_ref : (40, 3*4H) f32 constants:
              rows 0:32  -> [fc_w padded to 128 lanes | 0]
              row 32     -> [b0 | b1 | b2]  (b_ih+b_hh, g-cols pre-scaled by 2)
              row 33     -> [fc_b padded to 128 lanes | 0]
    out_ref: (Bp, 4H) f32 lane-dense output slab (col 0 is the real fc output)
    gx_ref : (T*Bp, 4H) f32 scratch for the hoisted layer-0 projection
    """
    T, B, H, L = SEQ_LEN, BATCH_PAD, HIDDEN_SIZE, NUM_LAYERS
    G = 4 * H

    # ---- Off-critical-path: layer-0 input->gate projection for every t -----
    gx_ref[...] = (
        jnp.dot(x_ref[...], w_ref[0:IN_PAD, 0:G],
                preferred_element_type=jnp.float32)
        + c_ref[H:H + 1, 0:G])

    # Layer-1/2 biases, broadcast once outside the unrolled loop
    # (JAX does not CSE broadcast_in_dim).
    b12 = jnp.broadcast_to(c_ref[H:H + 1, G:3 * G], (B, 2 * G))

    z = jnp.zeros((B, H), jnp.float32)
    h = [z, z, z]
    c = [z, z, z]

    # ---- Wavefront over diagonals d = t + l.  All active cells on a diagonal
    # share one block-bidiagonal bf16 matmul and one sigmoid pass.
    for d in range(T + L - 1):
        lhs = jnp.concatenate(h, axis=1).astype(jnp.bfloat16)        # (B, 3H)
        acc = jnp.dot(lhs, w_ref[IN_PAD:IN_PAD + 3 * H, :],
                      preferred_element_type=jnp.float32)            # (B, 3*4H)

        g0 = acc[:, 0:G]
        if d < T:  # layer-0 cell (0, t=d) active: add its precomputed x-proj
            g0 = g0 + gx_ref[d * B:(d + 1) * B, :]
        gates = jnp.concatenate([g0, acc[:, G:3 * G] + b12], axis=1)  # (B, 3*4H)
        sig = jax.nn.sigmoid(gates)   # single EUP pass covers all 3 layers

        for l in range(L):            # static trace-time schedule
            t = d - l
            if 0 <= t < T:            # cell (l, t) lies on this diagonal
                blk = sig[:, l * G:(l + 1) * G]
                i_g = blk[:, 0:H]
                f_g = blk[:, H:2 * H]
                g_g = 2.0 * blk[:, 2 * H:3 * H] - 1.0   # tanh(g)=2*sig(2g)-1
                o_g = blk[:, 3 * H:4 * H]
                c[l] = f_g * c[l] + i_g * g_g
                h[l] = o_g * jnp.tanh(c[l])

    # ---- fc(last hidden of top layer): lane-dense padded matmul + store ----
    out_ref[...] = (jnp.dot(h[L - 1], c_ref[0:H, 0:G],
                            preferred_element_type=jnp.float32)
                    + c_ref[H + 1:H + 2, 0:G])


def init_params(key):
    """Deterministic init matching nn.LSTM / nn.Linear parameter shapes."""
    params = {}
    H = HIDDEN_SIZE
    k = 1.0 / jnp.sqrt(H)
    for l in range(NUM_LAYERS):
        in_feat = INPUT_SIZE if l == 0 else H
        key, k1, k2, k3, k4 = jax.random.split(key, 5)
        w_ih = jax.random.uniform(k1, (4 * H, in_feat), jnp.float32, -k, k)
        w_hh = jax.random.uniform(k2, (4 * H, H), jnp.float32, -k, k)
        b_ih = jax.random.uniform(k3, (4 * H,), jnp.float32, -k, k)
        b_hh = jax.random.uniform(k4, (4 * H,), jnp.float32, -k, k)
        params[f"lstm_{l}"] = (w_ih, w_hh, b_ih, b_hh)
    key, k1, k2 = jax.random.split(key, 3)
    fc_w = jax.random.uniform(k1, (1, H), jnp.float32, -k, k)
    fc_b = jax.random.uniform(k2, (1,), jnp.float32, -k, k)
    params["fc"] = (fc_w, fc_b)
    return params


def lstm_model_forward(x, params):
    """x: (B, T, INPUT_SIZE) batch-first, as in the PyTorch module."""
    B, T, in_feat = x.shape
    assert T == SEQ_LEN and in_feat == INPUT_SIZE and B <= BATCH_PAD
    H = HIDDEN_SIZE
    G = 4 * H

    def scale_g(w):  # pre-scale the g-gate block (PyTorch order i,f,g,o) by 2
        return w.at[..., 2 * H:3 * H].multiply(2.0)

    # ---- input: time-major, batch + feature zero-padded, bf16 MXU operand --
    x_tm = jnp.transpose(x, (1, 0, 2)).astype(jnp.float32)            # (T,B,In)
    x_tm = jnp.pad(x_tm, ((0, 0), (0, BATCH_PAD - B), (0, IN_PAD - in_feat)))
    x_flat = x_tm.reshape(T * BATCH_PAD, IN_PAD).astype(jnp.bfloat16)

    # ---- per-layer weights transposed to (in, 4H), g-columns pre-scaled ----
    wt, bt = [], []
    for l in range(NUM_LAYERS):
        w_ih, w_hh, b_ih, b_hh = params[f"lstm_{l}"]
        wt.append((scale_g(w_ih.T.astype(jnp.float32)),
                   scale_g(w_hh.T.astype(jnp.float32))))
        bt.append(scale_g((b_ih + b_hh).astype(jnp.float32)))

    zero = jnp.zeros((H, G), jnp.float32)
    w0_pad = jnp.pad(wt[0][0], ((0, IN_PAD - INPUT_SIZE), (0, 2 * G)))  # (16,3G)
    w_big = jnp.concatenate([
        jnp.concatenate([wt[0][1], wt[1][0], zero], axis=1),   # h0 rows
        jnp.concatenate([zero, wt[1][1], wt[2][0]], axis=1),   # h1 rows
        jnp.concatenate([zero, zero, wt[2][1]], axis=1),       # h2 rows
    ], axis=0)                                                 # (3H, 3G)
    wpack = jnp.concatenate([w0_pad, w_big], axis=0).astype(jnp.bfloat16)

    # ---- f32 constant pack: fc weight (lane-padded), biases, fc bias -------
    fc_w, fc_b = params["fc"]
    fcw_pad = jnp.zeros((H, G), jnp.float32).at[:, 0].set(
        fc_w[0].astype(jnp.float32))
    bias_row = jnp.concatenate([bt[0], bt[1], bt[2]])[None, :]          # (1,3G)
    fcb_row = jnp.zeros((1, 3 * G), jnp.float32).at[0, 0].set(fc_b[0])
    cpack = jnp.concatenate([
        jnp.pad(fcw_pad, ((0, 0), (0, 2 * G))),   # rows 0:32
        bias_row,                                 # row 32
        fcb_row,                                  # row 33
        jnp.zeros((6, 3 * G), jnp.float32),       # pad to 40 rows
    ], axis=0)

    vmem = pl.BlockSpec(memory_space=pltpu.MemorySpace.VMEM)
    out_pad = pl.pallas_call(
        lstm_kernel,
        out_shape=jax.ShapeDtypeStruct((BATCH_PAD, G), jnp.float32),
        in_specs=[vmem, vmem, vmem],
        out_specs=vmem,
        scratch_shapes=[pltpu.VMEM((SEQ_LEN * BATCH_PAD, G), jnp.float32)],
    )(x_flat, wpack, cpack)
    # TODO(synk): for batch > BATCH_PAD add a batch grid axis with
    # dimension_semantics=("parallel",) so v7x's two TensorCores split work.
    return out_pad[:B, :1]


def reference_forward(x, params):
    """Pure-JAX reference mirroring PyTorch nn.LSTM + nn.Linear semantics."""
    B, T, _ = x.shape
    H = HIDDEN_SIZE
    seq = x
    for l in range(NUM_LAYERS):
        w_ih, w_hh, b_ih, b_hh = params[f"lstm_{l}"]
        h = jnp.zeros((B, H), jnp.float32)
        c = jnp.zeros((B, H), jnp.float32)
        outs = []
        for t in range(T):
            gates = seq[:, t, :] @ w_ih.T + b_ih + h @ w_hh.T + b_hh
            i_g = jax.nn.sigmoid(gates[:, :H])
            f_g = jax.nn.sigmoid(gates[:, H:2 * H])
            g_g = jnp.tanh(gates[:, 2 * H:3 * H])
            o_g = jax.nn.sigmoid(gates[:, 3 * H:])
            c = f_g * c + i_g * g_g
            h = o_g * jnp.tanh(c)
            outs.append(h)
        seq = jnp.stack(outs, axis=1)
    fc_w, fc_b = params["fc"]
    return seq[:, -1, :] @ fc_w.T + fc_b


if __name__ == "__main__":
    key = jax.random.PRNGKey(0)
    key, pkey, xkey = jax.random.split(key, 3)
    params = init_params(pkey)
    x = jax.random.normal(xkey, (BATCH, SEQ_LEN, INPUT_SIZE), jnp.float32)

    out = lstm_model_forward(x, params)
    jax.block_until_ready(out)
    assert out.shape == (BATCH, 1)

    ref = reference_forward(x, params)
    assert jnp.allclose(out, ref, atol=5e-2, rtol=5e-2), (out, ref)

    print("KERNEL_OK")
</pallas_src>

<mosaic_0001>
module attributes {stable_mosaic.version = 11 : i64} {
  func.func @lstm_kernel(%arg0: memref<64x16xbf16, #tpu.memory_space<vmem>>, %arg1: memref<112x384xbf16, #tpu.memory_space<vmem>>, %arg2: memref<40x384xf32, #tpu.memory_space<vmem>>, %arg3: memref<8x128xf32, #tpu.memory_space<vmem>>, %arg4: memref<64x128xf32, #tpu.memory_space<vmem>>) attributes {dimension_semantics = [], scalar_prefetch = 0 : i64, scratch_operands = 1 : i64, tpu.core_type = #tpu.core_type<tc>} {
    %c0 = arith.constant 0 : index
    %c0_0 = arith.constant 0 : index
    %0 = vector.load %arg0[%c0, %c0_0] : memref<64x16xbf16, #tpu.memory_space<vmem>>, vector<64x16xbf16>
    %c0_1 = arith.constant 0 : index
    %c0_2 = arith.constant 0 : index
    %1 = vector.load %arg1[%c0_1, %c0_2] : memref<112x384xbf16, #tpu.memory_space<vmem>>, vector<16x128xbf16>
    %cst = arith.constant dense<0.000000e+00> : vector<64x128xf32>
    %2 = tpu.matmul %0, %1, %cst {dimension_numbers = #tpu.dot_dimension_numbers<[1], [0], [0], [1], [0, 0, 1, 1], [], []>} : vector<64x16xbf16>, vector<16x128xbf16>, vector<64x128xf32> -> vector<64x128xf32>
    %c32 = arith.constant 32 : index
    %c0_3 = arith.constant 0 : index
    %3 = vector.load %arg2[%c32, %c0_3] : memref<40x384xf32, #tpu.memory_space<vmem>>, vector<1x128xf32>
    %4 = vector.broadcast %3 : vector<1x128xf32> to vector<64x128xf32>
    %5 = arith.addf %2, %4 : vector<64x128xf32>
    %c0_4 = arith.constant 0 : index
    %c0_5 = arith.constant 0 : index
    %6 = vector.load %arg4[%c0_4, %c0_5] : memref<64x128xf32, #tpu.memory_space<vmem>>, vector<64x128xf32>
    tpu.vector_store %arg4[%c0_4, %c0_5], %5 {strides = array<i32>} : memref<64x128xf32, #tpu.memory_space<vmem>>, vector<64x128xf32>,
    %c32_6 = arith.constant 32 : index
    %c128 = arith.constant 128 : index
    %7 = vector.load %arg2[%c32_6, %c128] : memref<40x384xf32, #tpu.memory_space<vmem>>, vector<1x256xf32>
    %8 = vector.shape_cast %7 : vector<1x256xf32> to vector<1x256xf32>
    %9 = vector.broadcast %8 : vector<1x256xf32> to vector<8x256xf32>
    %cst_7 = arith.constant 0.000000e+00 : f32
    %10 = vector.broadcast %cst_7 : f32 to vector<8x32xf32>
    %11 = tpu.concatenate %10, %10, %10 in 1 : vector<8x32xf32>, vector<8x32xf32>, vector<8x32xf32> -> vector<8x96xf32>
    %12 = arith.truncf %11 : vector<8x96xf32> to vector<8x96xbf16>
    %c16 = arith.constant 16 : index
    %c0_8 = arith.constant 0 : index
    %13 = vector.load %arg1[%c16, %c0_8] : memref<112x384xbf16, #tpu.memory_space<vmem>>, vector<96x384xbf16>
    %cst_9 = arith.constant dense<0.000000e+00> : vector<8x384xf32>
    %14 = tpu.matmul %12, %13, %cst_9 {dimension_numbers = #tpu.dot_dimension_numbers<[1], [0], [0], [1], [0, 0, 1, 1], [], []>} : vector<8x96xbf16>, vector<96x384xbf16>, vector<8x384xf32> -> vector<8x384xf32>
    %15 = vector.extract_strided_slice %14 {offsets = [0, 0], sizes = [8, 128], strides = [1, 1]} : vector<8x384xf32> to vector<8x128xf32>
    %c0_10 = arith.constant 0 : index
    %c0_11 = arith.constant 0 : index
    %16 = vector.load %arg4[%c0_10, %c0_11] : memref<64x128xf32, #tpu.memory_space<vmem>>, vector<8x128xf32>
    %17 = arith.addf %15, %16 : vector<8x128xf32>
    %18 = vector.extract_strided_slice %14 {offsets = [0, 128], sizes = [8, 256], strides = [1, 1]} : vector<8x384xf32> to vector<8x256xf32>
    %19 = arith.addf %18, %9 : vector<8x256xf32>
    %20 = tpu.concatenate %17, %19 in 1 : vector<8x128xf32>, vector<8x256xf32> -> vector<8x384xf32>
    %21 = arith.negf %20 : vector<8x384xf32>
    %22 = math.exp %21 : vector<8x384xf32>
    %cst_12 = arith.constant 1.000000e+00 : f32
    %23 = vector.broadcast %cst_12 : f32 to vector<8x384xf32>
    %24 = arith.addf %23, %22 : vector<8x384xf32>
    %25 = arith.divf %23, %24 : vector<8x384xf32>
    %26 = vector.extract_strided_slice %25 {offsets = [0, 0], sizes = [8, 128], strides = [1, 1]} : vector<8x384xf32> to vector<8x128xf32>
    %27 = vector.extract_strided_slice %26 {offsets = [0, 0], sizes = [8, 32], strides = [1, 1]} : vector<8x128xf32> to vector<8x32xf32>
    %28 = vector.extract_strided_slice %26 {offsets = [0, 32], sizes = [8, 32], strides = [1, 1]} : vector<8x128xf32> to vector<8x32xf32>
    %29 = vector.extract_strided_slice %26 {offsets = [0, 64], sizes = [8, 32], strides = [1, 1]} : vector<8x128xf32> to vector<8x32xf32>
    %cst_13 = arith.constant 2.000000e+00 : f32
    %30 = vector.broadcast %cst_13 : f32 to vector<8x32xf32>
    %31 = arith.mulf %30, %29 : vector<8x32xf32>
    %cst_14 = arith.constant 1.000000e+00 : f32
    %32 = vector.broadcast %cst_14 : f32 to vector<8x32xf32>
    %33 = arith.subf %31, %32 : vector<8x32xf32>
    %34 = vector.extract_strided_slice %26 {offsets = [0, 96], sizes = [8, 32], strides = [1, 1]} : vector<8x128xf32> to vector<8x32xf32>
    %35 = arith.mulf %28, %10 : vector<8x32xf32>
    %36 = arith.mulf %27, %33 : vector<8x32xf32>
    %37 = arith.addf %35, %36 : vector<8x32xf32>
    %38 = math.tanh %37 : vector<8x32xf32>
    %39 = arith.mulf %34, %38 : vector<8x32xf32>
    %40 = tpu.concatenate %39, %10, %10 in 1 : vector<8x32xf32>, vector<8x32xf32>, vector<8x32xf32> -> vector<8x96xf32>
    %41 = arith.truncf %40 : vector<8x96xf32> to vector<8x96xbf16>
    %c16_15 = arith.constant 16 : index
    %c0_16 = arith.constant 0 : index
    %42 = vector.load %arg1[%c16_15, %c0_16] : memref<112x384xbf16, #tpu.memory_space<vmem>>, vector<96x384xbf16>
    %cst_17 = arith.constant dense<0.000000e+00> : vector<8x384xf32>
    %43 = tpu.matmul %41, %42, %cst_17 {dimension_numbers = #tpu.dot_dimension_numbers<[1], [0], [0], [1], [0, 0, 1, 1], [], []>} : vector<8x96xbf16>, vector<96x384xbf16>, vector<8x384xf32> -> vector<8x384xf32>
    %44 = vector.extract_strided_slice %43 {offsets = [0, 0], sizes = [8, 128], strides = [1, 1]} : vector<8x384xf32> to vector<8x128xf32>
    %c8 = arith.constant 8 : index
    %c0_18 = arith.constant 0 : index
    %45 = vector.load %arg4[%c8, %c0_18] : memref<64x128xf32, #tpu.memory_space<vmem>>, vector<8x128xf32>
    %46 = arith.addf %44, %45 : vector<8x128xf32>
    %47 = vector.extract_strided_slice %43 {offsets = [0, 128], sizes = [8, 256], strides = [1, 1]} : vector<8x384xf32> to vector<8x256xf32>
    %48 = arith.addf %47, %9 : vector<8x256xf32>
    %49 = tpu.concatenate %46, %48 in 1 : vector<8x128xf32>, vector<8x256xf32> -> vector<8x384xf32>
    %50 = arith.negf %49 : vector<8x384xf32>
    %51 = math.exp %50 : vector<8x384xf32>
    %cst_19 = arith.constant 1.000000e+00 : f32
    %52 = vector.broadcast %cst_19 : f32 to vector<8x384xf32>
    %53 = arith.addf %52, %51 : vector<8x384xf32>
    %54 = arith.divf %52, %53 : vector<8x384xf32>
    %55 = vector.extract_strided_slice %54 {offsets = [0, 0], sizes = [8, 128], strides = [1, 1]} : vector<8x384xf32> to vector<8x128xf32>
    %56 = vector.extract_strided_slice %55 {offsets = [0, 0], sizes = [8, 32], strides = [1, 1]} : vector<8x128xf32> to vector<8x32xf32>
    %57 = vector.extract_strided_slice %55 {offsets = [0, 32], sizes = [8, 32], strides = [1, 1]} : vector<8x128xf32> to vector<8x32xf32>
    %58 = vector.extract_strided_slice %55 {offsets = [0, 64], sizes = [8, 32], strides = [1, 1]} : vector<8x128xf32> to vector<8x32xf32>
    %cst_20 = arith.constant 2.000000e+00 : f32
    %59 = vector.broadcast %cst_20 : f32 to vector<8x32xf32>
    %60 = arith.mulf %59, %58 : vector<8x32xf32>
    %cst_21 = arith.constant 1.000000e+00 : f32
    %61 = vector.broadcast %cst_21 : f32 to vector<8x32xf32>
    %62 = arith.subf %60, %61 : vector<8x32xf32>
    %63 = vector.extract_strided_slice %55 {offsets = [0, 96], sizes = [8, 32], strides = [1, 1]} : vector<8x128xf32> to vector<8x32xf32>
    %64 = arith.mulf %57, %37 : vector<8x32xf32>
    %65 = arith.mulf %56, %62 : vector<8x32xf32>
    %66 = arith.addf %64, %65 : vector<8x32xf32>
    %67 = math.tanh %66 : vector<8x32xf32>
    %68 = arith.mulf %63, %67 : vector<8x32xf32>
    %69 = vector.extract_strided_slice %54 {offsets = [0, 128], sizes = [8, 128], strides = [1, 1]} : vector<8x384xf32> to vector<8x128xf32>
    %70 = vector.extract_strided_slice %69 {offsets = [0, 0], sizes = [8, 32], strides = [1, 1]} : vector<8x128xf32> to vector<8x32xf32>
    %71 = vector.extract_strided_slice %69 {offsets = [0, 32], sizes = [8, 32], strides = [1, 1]} : vector<8x128xf32> to vector<8x32xf32>
    %72 = vector.extract_strided_slice %69 {offsets = [0, 64], sizes = [8, 32], strides = [1, 1]} : vector<8x128xf32> to vector<8x32xf32>
    %cst_22 = arith.constant 2.000000e+00 : f32
    %73 = vector.broadcast %cst_22 : f32 to vector<8x32xf32>
    %74 = arith.mulf %73, %72 : vector<8x32xf32>
    %cst_23 = arith.constant 1.000000e+00 : f32
    %75 = vector.broadcast %cst_23 : f32 to vector<8x32xf32>
    %76 = arith.subf %74, %75 : vector<8x32xf32>
    %77 = vector.extract_strided_slice %69 {offsets = [0, 96], sizes = [8, 32], strides = [1, 1]} : vector<8x128xf32> to vector<8x32xf32>
    %78 = arith.mulf %71, %10 : vector<8x32xf32>
    %79 = arith.mulf %70, %76 : vector<8x32xf32>
    %80 = arith.addf %78, %79 : vector<8x32xf32>
    %81 = math.tanh %80 : vector<8x32xf32>
    %82 = arith.mulf %77, %81 : vector<8x32xf32>
    %83 = tpu.concatenate %68, %82, %10 in 1 : vector<8x32xf32>, vector<8x32xf32>, vector<8x32xf32> -> vector<8x96xf32>
    %84 = arith.truncf %83 : vector<8x96xf32> to vector<8x96xbf16>
    %c16_24 = arith.constant 16 : index
    %c0_25 = arith.constant 0 : index
    %85 = vector.load %arg1[%c16_24, %c0_25] : memref<112x384xbf16, #tpu.memory_space<vmem>>, vector<96x384xbf16>
    %cst_26 = arith.constant dense<0.000000e+00> : vector<8x384xf32>
    %86 = tpu.matmul %84, %85, %cst_26 {dimension_numbers = #tpu.dot_dimension_numbers<[1], [0], [0], [1], [0, 0, 1, 1], [], []>} : vector<8x96xbf16>, vector<96x384xbf16>, vector<8x384xf32> -> vector<8x384xf32>
    %87 = vector.extract_strided_slice %86 {offsets = [0, 0], sizes = [8, 128], strides = [1, 1]} : vector<8x384xf32> to vector<8x128xf32>
    %c16_27 = arith.constant 16 : index
    %c0_28 = arith.constant 0 : index
    %88 = vector.load %arg4[%c16_27, %c0_28] : memref<64x128xf32, #tpu.memory_space<vmem>>, vector<8x128xf32>
    %89 = arith.addf %87, %88 : vector<8x128xf32>
    %90 = vector.extract_strided_slice %86 {offsets = [0, 128], sizes = [8, 256], strides = [1, 1]} : vector<8x384xf32> to vector<8x256xf32>
    %91 = arith.addf %90, %9 : vector<8x256xf32>
    %92 = tpu.concatenate %89, %91 in 1 : vector<8x128xf32>, vector<8x256xf32> -> vector<8x384xf32>
    %93 = arith.negf %92 : vector<8x384xf32>
    %94 = math.exp %93 : vector<8x384xf32>
    %cst_29 = arith.constant 1.000000e+00 : f32
    %95 = vector.broadcast %cst_29 : f32 to vector<8x384xf32>
    %96 = arith.addf %95, %94 : vector<8x384xf32>
    %97 = arith.divf %95, %96 : vector<8x384xf32>
    %98 = vector.extract_strided_slice %97 {offsets = [0, 0], sizes = [8, 128], strides = [1, 1]} : vector<8x384xf32> to vector<8x128xf32>
    %99 = vector.extract_strided_slice %98 {offsets = [0, 0], sizes = [8, 32], strides = [1, 1]} : vector<8x128xf32> to vector<8x32xf32>
    %100 = vector.extract_strided_slice %98 {offsets = [0, 32], sizes = [8, 32], strides = [1, 1]} : vector<8x128xf32> to vector<8x32xf32>
    %101 = vector.extract_strided_slice %98 {offsets = [0, 64], sizes = [8, 32], strides = [1, 1]} : vector<8x128xf32> to vector<8x32xf32>
    %cst_30 = arith.constant 2.000000e+00 : f32
    %102 = vector.broadcast %cst_30 : f32 to vector<8x32xf32>
    %103 = arith.mulf %102, %101 : vector<8x32xf32>
    %cst_31 = arith.constant 1.000000e+00 : f32
    %104 = vector.broadcast %cst_31 : f32 to vector<8x32xf32>
    %105 = arith.subf %103, %104 : vector<8x32xf32>
    %106 = vector.extract_strided_slice %98 {offsets = [0, 96], sizes = [8, 32], strides = [1, 1]} : vector<8x128xf32> to vector<8x32xf32>
    %107 = arith.mulf %100, %66 : vector<8x32xf32>
    %108 = arith.mulf %99, %105 : vector<8x32xf32>
    %109 = arith.addf %107, %108 : vector<8x32xf32>
    %110 = math.tanh %109 : vector<8x32xf32>
    %111 = arith.mulf %106, %110 : vector<8x32xf32>
    %112 = vector.extract_strided_slice %97 {offsets = [0, 128], sizes = [8, 128], strides = [1, 1]} : vector<8x384xf32> to vector<8x128xf32>
    %113 = vector.extract_strided_slice %112 {offsets = [0, 0], sizes = [8, 32], strides = [1, 1]} : vector<8x128xf32> to vector<8x32xf32>
    %114 = vector.extract_strided_slice %112 {offsets = [0, 32], sizes = [8, 32], strides = [1, 1]} : vector<8x128xf32> to vector<8x32xf32>
    %115 = vector.extract_strided_slice %112 {offsets = [0, 64], sizes = [8, 32], strides = [1, 1]} : vector<8x128xf32> to vector<8x32xf32>
    %cst_32 = arith.constant 2.000000e+00 : f32
    %116 = vector.broadcast %cst_32 : f32 to vector<8x32xf32>
    %117 = arith.mulf %116, %115 : vector<8x32xf32>
    %cst_33 = arith.constant 1.000000e+00 : f32
    %118 = vector.broadcast %cst_33 : f32 to vector<8x32xf32>
    %119 = arith.subf %117, %118 : vector<8x32xf32>
    %120 = vector.extract_strided_slice %112 {offsets = [0, 96], sizes = [8, 32], strides = [1, 1]} : vector<8x128xf32> to vector<8x32xf32>
    %121 = arith.mulf %114, %80 : vector<8x32xf32>
    %122 = arith.mulf %113, %119 : vector<8x32xf32>
    %123 = arith.addf %121, %122 : vector<8x32xf32>
    %124 = math.tanh %123 : vector<8x32xf32>
    %125 = arith.mulf %120, %124 : vector<8x32xf32>
    %126 = vector.extract_strided_slice %97 {offsets = [0, 256], sizes = [8, 128], strides = [1, 1]} : vector<8x384xf32> to vector<8x128xf32>
    %127 = vector.extract_strided_slice %126 {offsets = [0, 0], sizes = [8, 32], strides = [1, 1]} : vector<8x128xf32> to vector<8x32xf32>
    %128 = vector.extract_strided_slice %126 {offsets = [0, 32], sizes = [8, 32], strides = [1, 1]} : vector<8x128xf32> to vector<8x32xf32>
    %129 = vector.extract_strided_slice %126 {offsets = [0, 64], sizes = [8, 32], strides = [1, 1]} : vector<8x128xf32> to vector<8x32xf32>
    %cst_34 = arith.constant 2.000000e+00 : f32
    %130 = vector.broadcast %cst_34 : f32 to vector<8x32xf32>
    %131 = arith.mulf %130, %129 : vector<8x32xf32>
    %cst_35 = arith.constant 1.000000e+00 : f32
    %132 = vector.broadcast %cst_35 : f32 to vector<8x32xf32>
    %133 = arith.subf %131, %132 : vector<8x32xf32>
    %134 = vector.extract_strided_slice %126 {offsets = [0, 96], sizes = [8, 32], strides = [1, 1]} : vector<8x128xf32> to vector<8x32xf32>
    %135 = arith.mulf %128, %10 : vector<8x32xf32>
    %136 = arith.mulf %127, %133 : vector<8x32xf32>
    %137 = arith.addf %135, %136 : vector<8x32xf32>
    %138 = math.tanh %137 : vector<8x32xf32>
    %139 = arith.mulf %134, %138 : vector<8x32xf32>
    %140 = tpu.concatenate %111, %125, %139 in 1 : vector<8x32xf32>, vector<8x32xf32>, vector<8x32xf32> -> vector<8x96xf32>
    %141 = arith.truncf %140 : vector<8x96xf32> to vector<8x96xbf16>
    %c16_36 = arith.constant 16 : index
    %c0_37 = arith.constant 0 : index
    %142 = vector.load %arg1[%c16_36, %c0_37] : memref<112x384xbf16, #tpu.memory_space<vmem>>, vector<96x384xbf16>
    %cst_38 = arith.constant dense<0.000000e+00> : vector<8x384xf32>
    %143 = tpu.matmul %141, %142, %cst_38 {dimension_numbers = #tpu.dot_dimension_numbers<[1], [0], [0], [1], [0, 0, 1, 1], [], []>} : vector<8x96xbf16>, vector<96x384xbf16>, vector<8x384xf32> -> vector<8x384xf32>
    %144 = vector.extract_strided_slice %143 {offsets = [0, 0], sizes = [8, 128], strides = [1, 1]} : vector<8x384xf32> to vector<8x128xf32>
    %c24 = arith.constant 24 : index
    %c0_39 = arith.constant 0 : index
    %145 = vector.load %arg4[%c24, %c0_39] : memref<64x128xf32, #tpu.memory_space<vmem>>, vector<8x128xf32>
    %146 = arith.addf %144, %145 : vector<8x128xf32>
    %147 = vector.extract_strided_slice %143 {offsets = [0, 128], sizes = [8, 256], strides = [1, 1]} : vector<8x384xf32> to vector<8x256xf32>
    %148 = arith.addf %147, %9 : vector<8x256xf32>
    %149 = tpu.concatenate %146, %148 in 1 : vector<8x128xf32>, vector<8x256xf32> -> vector<8x384xf32>
    %150 = arith.negf %149 : vector<8x384xf32>
    %151 = math.exp %150 : vector<8x384xf32>
    %cst_40 = arith.constant 1.000000e+00 : f32
    %152 = vector.broadcast %cst_40 : f32 to vector<8x384xf32>
    %153 = arith.addf %152, %151 : vector<8x384xf32>
    %154 = arith.divf %152, %153 : vector<8x384xf32>
    %155 = vector.extract_strided_slice %154 {offsets = [0, 0], sizes = [8, 128], strides = [1, 1]} : vector<8x384xf32> to vector<8x128xf32>
    %156 = vector.extract_strided_slice %155 {offsets = [0, 0], sizes = [8, 32], strides = [1, 1]} : vector<8x128xf32> to vector<8x32xf32>
    %157 = vector.extract_strided_slice %155 {offsets = [0, 32], sizes = [8, 32], strides = [1, 1]} : vector<8x128xf32> to vector<8x32xf32>
    %158 = vector.extract_strided_slice %155 {offsets = [0, 64], sizes = [8, 32], strides = [1, 1]} : vector<8x128xf32> to vector<8x32xf32>
    %cst_41 = arith.constant 2.000000e+00 : f32
    %159 = vector.broadcast %cst_41 : f32 to vector<8x32xf32>
    %160 = arith.mulf %159, %158 : vector<8x32xf32>
    %cst_42 = arith.constant 1.000000e+00 : f32
    %161 = vector.broadcast %cst_42 : f32 to vector<8x32xf32>
    %162 = arith.subf %160, %161 : vector<8x32xf32>
    %163 = vector.extract_strided_slice %155 {offsets = [0, 96], sizes = [8, 32], strides = [1, 1]} : vector<8x128xf32> to vector<8x32xf32>
    %164 = arith.mulf %157, %109 : vector<8x32xf32>
    %165 = arith.mulf %156, %162 : vector<8x32xf32>
    %166 = arith.addf %164, %165 : vector<8x32xf32>
    %167 = math.tanh %166 : vector<8x32xf32>
    %168 = arith.mulf %163, %167 : vector<8x32xf32>
    %169 = vector.extract_strided_slice %154 {offsets = [0, 128], sizes = [8, 128], strides = [1, 1]} : vector<8x384xf32> to vector<8x128xf32>
    %170 = vector.extract_strided_slice %169 {offsets = [0, 0], sizes = [8, 32], strides = [1, 1]} : vector<8x128xf32> to vector<8x32xf32>
    %171 = vector.extract_strided_slice %169 {offsets = [0, 32], sizes = [8, 32], strides = [1, 1]} : vector<8x128xf32> to vector<8x32xf32>
    %172 = vector.extract_strided_slice %169 {offsets = [0, 64], sizes = [8, 32], strides = [1, 1]} : vector<8x128xf32> to vector<8x32xf32>
    %cst_43 = arith.constant 2.000000e+00 : f32
    %173 = vector.broadcast %cst_43 : f32 to vector<8x32xf32>
    %174 = arith.mulf %173, %172 : vector<8x32xf32>
    %cst_44 = arith.constant 1.000000e+00 : f32
    %175 = vector.broadcast %cst_44 : f32 to vector<8x32xf32>
    %176 = arith.subf %174, %175 : vector<8x32xf32>
    %177 = vector.extract_strided_slice %169 {offsets = [0, 96], sizes = [8, 32], strides = [1, 1]} : vector<8x128xf32> to vector<8x32xf32>
    %178 = arith.mulf %171, %123 : vector<8x32xf32>
    %179 = arith.mulf %170, %176 : vector<8x32xf32>
    %180 = arith.addf %178, %179 : vector<8x32xf32>
    %181 = math.tanh %180 : vector<8x32xf32>
    %182 = arith.mulf %177, %181 : vector<8x32xf32>
    %183 = vector.extract_strided_slice %154 {offsets = [0, 256], sizes = [8, 128], strides = [1, 1]} : vector<8x384xf32> to vector<8x128xf32>
    %184 = vector.extract_strided_slice %183 {offsets = [0, 0], sizes = [8, 32], strides = [1, 1]} : vector<8x128xf32> to vector<8x32xf32>
    %185 = vector.extract_strided_slice %183 {offsets = [0, 32], sizes = [8, 32], strides = [1, 1]} : vector<8x128xf32> to vector<8x32xf32>
    %186 = vector.extract_strided_slice %183 {offsets = [0, 64], sizes = [8, 32], strides = [1, 1]} : vector<8x128xf32> to vector<8x32xf32>
    %cst_45 = arith.constant 2.000000e+00 : f32
    %187 = vector.broadcast %cst_45 : f32 to vector<8x32xf32>
    %188 = arith.mulf %187, %186 : vector<8x32xf32>
    %cst_46 = arith.constant 1.000000e+00 : f32
    %189 = vector.broadcast %cst_46 : f32 to vector<8x32xf32>
    %190 = arith.subf %188, %189 : vector<8x32xf32>
    %191 = vector.extract_strided_slice %183 {offsets = [0, 96], sizes = [8, 32], strides = [1, 1]} : vector<8x128xf32> to vector<8x32xf32>
    %192 = arith.mulf %185, %137 : vector<8x32xf32>
    %193 = arith.mulf %184, %190 : vector<8x32xf32>
    %194 = arith.addf %192, %193 : vector<8x32xf32>
    %195 = math.tanh %194 : vector<8x32xf32>
    %196 = arith.mulf %191, %195 : vector<8x32xf32>
    %197 = tpu.concatenate %168, %182, %196 in 1 : vector<8x32xf32>, vector<8x32xf32>, vector<8x32xf32> -> vector<8x96xf32>
    %198 = arith.truncf %197 : vector<8x96xf32> to vector<8x96xbf16>
    %c16_47 = arith.constant 16 : index
    %c0_48 = arith.constant 0 : index
    %199 = vector.load %arg1[%c16_47, %c0_48] : memref<112x384xbf16, #tpu.memory_space<vmem>>, vector<96x384xbf16>
    %cst_49 = arith.constant dense<0.000000e+00> : vector<8x384xf32>
    %200 = tpu.matmul %198, %199, %cst_49 {dimension_numbers = #tpu.dot_dimension_numbers<[1], [0], [0], [1], [0, 0, 1, 1], [], []>} : vector<8x96xbf16>, vector<96x384xbf16>, vector<8x384xf32> -> vector<8x384xf32>
    %201 = vector.extract_strided_slice %200 {offsets = [0, 0], sizes = [8, 128], strides = [1, 1]} : vector<8x384xf32> to vector<8x128xf32>
    %c32_50 = arith.constant 32 : index
    %c0_51 = arith.constant 0 : index
    %202 = vector.load %arg4[%c32_50, %c0_51] : memref<64x128xf32, #tpu.memory_space<vmem>>, vector<8x128xf32>
    %203 = arith.addf %201, %202 : vector<8x128xf32>
    %204 = vector.extract_strided_slice %200 {offsets = [0, 128], sizes = [8, 256], strides = [1, 1]} : vector<8x384xf32> to vector<8x256xf32>
    %205 = arith.addf %204, %9 : vector<8x256xf32>
    %206 = tpu.concatenate %203, %205 in 1 : vector<8x128xf32>, vector<8x256xf32> -> vector<8x384xf32>
    %207 = arith.negf %206 : vector<8x384xf32>
    %208 = math.exp %207 : vector<8x384xf32>
    %cst_52 = arith.constant 1.000000e+00 : f32
    %209 = vector.broadcast %cst_52 : f32 to vector<8x384xf32>
    %210 = arith.addf %209, %208 : vector<8x384xf32>
    %211 = arith.divf %209, %210 : vector<8x384xf32>
    %212 = vector.extract_strided_slice %211 {offsets = [0, 0], sizes = [8, 128], strides = [1, 1]} : vector<8x384xf32> to vector<8x128xf32>
    %213 = vector.extract_strided_slice %212 {offsets = [0, 0], sizes = [8, 32], strides = [1, 1]} : vector<8x128xf32> to vector<8x32xf32>
    %214 = vector.extract_strided_slice %212 {offsets = [0, 32], sizes = [8, 32], strides = [1, 1]} : vector<8x128xf32> to vector<8x32xf32>
    %215 = vector.extract_strided_slice %212 {offsets = [0, 64], sizes = [8, 32], strides = [1, 1]} : vector<8x128xf32> to vector<8x32xf32>
    %cst_53 = arith.constant 2.000000e+00 : f32
    %216 = vector.broadcast %cst_53 : f32 to vector<8x32xf32>
    %217 = arith.mulf %216, %215 : vector<8x32xf32>
    %cst_54 = arith.constant 1.000000e+00 : f32
    %218 = vector.broadcast %cst_54 : f32 to vector<8x32xf32>
    %219 = arith.subf %217, %218 : vector<8x32xf32>
    %220 = vector.extract_strided_slice %212 {offsets = [0, 96], sizes = [8, 32], strides = [1, 1]} : vector<8x128xf32> to vector<8x32xf32>
    %221 = arith.mulf %214, %166 : vector<8x32xf32>
    %222 = arith.mulf %213, %219 : vector<8x32xf32>
    %223 = arith.addf %221, %222 : vector<8x32xf32>
    %224 = math.tanh %223 : vector<8x32xf32>
    %225 = arith.mulf %220, %224 : vector<8x32xf32>
    %226 = vector.extract_strided_slice %211 {offsets = [0, 128], sizes = [8, 128], strides = [1, 1]} : vector<8x384xf32> to vector<8x128xf32>
    %227 = vector.extract_strided_slice %226 {offsets = [0, 0], sizes = [8, 32], strides = [1, 1]} : vector<8x128xf32> to vector<8x32xf32>
    %228 = vector.extract_strided_slice %226 {offsets = [0, 32], sizes = [8, 32], strides = [1, 1]} : vector<8x128xf32> to vector<8x32xf32>
    %229 = vector.extract_strided_slice %226 {offsets = [0, 64], sizes = [8, 32], strides = [1, 1]} : vector<8x128xf32> to vector<8x32xf32>
    %cst_55 = arith.constant 2.000000e+00 : f32
    %230 = vector.broadcast %cst_55 : f32 to vector<8x32xf32>
    %231 = arith.mulf %230, %229 : vector<8x32xf32>
    %cst_56 = arith.constant 1.000000e+00 : f32
    %232 = vector.broadcast %cst_56 : f32 to vector<8x32xf32>
    %233 = arith.subf %231, %232 : vector<8x32xf32>
    %234 = vector.extract_strided_slice %226 {offsets = [0, 96], sizes = [8, 32], strides = [1, 1]} : vector<8x128xf32> to vector<8x32xf32>
    %235 = arith.mulf %228, %180 : vector<8x32xf32>
    %236 = arith.mulf %227, %233 : vector<8x32xf32>
    %237 = arith.addf %235, %236 : vector<8x32xf32>
    %238 = math.tanh %237 : vector<8x32xf32>
    %239 = arith.mulf %234, %238 : vector<8x32xf32>
    %240 = vector.extract_strided_slice %211 {offsets = [0, 256], sizes = [8, 128], strides = [1, 1]} : vector<8x384xf32> to vector<8x128xf32>
    %241 = vector.extract_strided_slice %240 {offsets = [0, 0], sizes = [8, 32], strides = [1, 1]} : vector<8x128xf32> to vector<8x32xf32>
    %242 = vector.extract_strided_slice %240 {offsets = [0, 32], sizes = [8, 32], strides = [1, 1]} : vector<8x128xf32> to vector<8x32xf32>
    %243 = vector.extract_strided_slice %240 {offsets = [0, 64], sizes = [8, 32], strides = [1, 1]} : vector<8x128xf32> to vector<8x32xf32>
    %cst_57 = arith.constant 2.000000e+00 : f32
    %244 = vector.broadcast %cst_57 : f32 to vector<8x32xf32>
    %245 = arith.mulf %244, %243 : vector<8x32xf32>
    %cst_58 = arith.constant 1.000000e+00 : f32
    %246 = vector.broadcast %cst_58 : f32 to vector<8x32xf32>
    %247 = arith.subf %245, %246 : vector<8x32xf32>
    %248 = vector.extract_strided_slice %240 {offsets = [0, 96], sizes = [8, 32], strides = [1, 1]} : vector<8x128xf32> to vector<8x32xf32>
    %249 = arith.mulf %242, %194 : vector<8x32xf32>
    %250 = arith.mulf %241, %247 : vector<8x32xf32>
    %251 = arith.addf %249, %250 : vector<8x32xf32>
    %252 = math.tanh %251 : vector<8x32xf32>
    %253 = arith.mulf %248, %252 : vector<8x32xf32>
    %254 = tpu.concatenate %225, %239, %253 in 1 : vector<8x32xf32>, vector<8x32xf32>, vector<8x32xf32> -> vector<8x96xf32>
    %255 = arith.truncf %254 : vector<8x96xf32> to vector<8x96xbf16>
    %c16_59 = arith.constant 16 : index
    %c0_60 = arith.constant 0 : index
    %256 = vector.load %arg1[%c16_59, %c0_60] : memref<112x384xbf16, #tpu.memory_space<vmem>>, vector<96x384xbf16>
    %cst_61 = arith.constant dense<0.000000e+00> : vector<8x384xf32>
    %257 = tpu.matmul %255, %256, %cst_61 {dimension_numbers = #tpu.dot_dimension_numbers<[1], [0], [0], [1], [0, 0, 1, 1], [], []>} : vector<8x96xbf16>, vector<96x384xbf16>, vector<8x384xf32> -> vector<8x384xf32>
    %258 = vector.extract_strided_slice %257 {offsets = [0, 0], sizes = [8, 128], strides = [1, 1]} : vector<8x384xf32> to vector<8x128xf32>
    %c40 = arith.constant 40 : index
    %c0_62 = arith.constant 0 : index
    %259 = vector.load %arg4[%c40, %c0_62] : memref<64x128xf32, #tpu.memory_space<vmem>>, vector<8x128xf32>
    %260 = arith.addf %258, %259 : vector<8x128xf32>
    %261 = vector.extract_strided_slice %257 {offsets = [0, 128], sizes = [8, 256], strides = [1, 1]} : vector<8x384xf32> to vector<8x256xf32>
    %262 = arith.addf %261, %9 : vector<8x256xf32>
    %263 = tpu.concatenate %260, %262 in 1 : vector<8x128xf32>, vector<8x256xf32> -> vector<8x384xf32>
    %264 = arith.negf %263 : vector<8x384xf32>
    %265 = math.exp %264 : vector<8x384xf32>
    %cst_63 = arith.constant 1.000000e+00 : f32
    %266 = vector.broadcast %cst_63 : f32 to vector<8x384xf32>
    %267 = arith.addf %266, %265 : vector<8x384xf32>
    %268 = arith.divf %266, %267 : vector<8x384xf32>
    %269 = vector.extract_strided_slice %268 {offsets = [0, 0], sizes = [8, 128], strides = [1, 1]} : vector<8x384xf32> to vector<8x128xf32>
    %270 = vector.extract_strided_slice %269 {offsets = [0, 0], sizes = [8, 32], strides = [1, 1]} : vector<8x128xf32> to vector<8x32xf32>
    %271 = vector.extract_strided_slice %269 {offsets = [0, 32], sizes = [8, 32], strides = [1, 1]} : vector<8x128xf32> to vector<8x32xf32>
    %272 = vector.extract_strided_slice %269 {offsets = [0, 64], sizes = [8, 32], strides = [1, 1]} : vector<8x128xf32> to vector<8x32xf32>
    %cst_64 = arith.constant 2.000000e+00 : f32
    %273 = vector.broadcast %cst_64 : f32 to vector<8x32xf32>
    %274 = arith.mulf %273, %272 : vector<8x32xf32>
    %cst_65 = arith.constant 1.000000e+00 : f32
    %275 = vector.broadcast %cst_65 : f32 to vector<8x32xf32>
    %276 = arith.subf %274, %275 : vector<8x32xf32>
    %277 = vector.extract_strided_slice %269 {offsets = [0, 96], sizes = [8, 32], strides = [1, 1]} : vector<8x128xf32> to vector<8x32xf32>
    %278 = arith.mulf %271, %223 : vector<8x32xf32>
    %279 = arith.mulf %270, %276 : vector<8x32xf32>
    %280 = arith.addf %278, %279 : vector<8x32xf32>
    %281 = math.tanh %280 : vector<8x32xf32>
    %282 = arith.mulf %277, %281 : vector<8x32xf32>
    %283 = vector.extract_strided_slice %268 {offsets = [0, 128], sizes = [8, 128], strides = [1, 1]} : vector<8x384xf32> to vector<8x128xf32>
    %284 = vector.extract_strided_slice %283 {offsets = [0, 0], sizes = [8, 32], strides = [1, 1]} : vector<8x128xf32> to vector<8x32xf32>
    %285 = vector.extract_strided_slice %283 {offsets = [0, 32], sizes = [8, 32], strides = [1, 1]} : vector<8x128xf32> to vector<8x32xf32>
    %286 = vector.extract_strided_slice %283 {offsets = [0, 64], sizes = [8, 32], strides = [1, 1]} : vector<8x128xf32> to vector<8x32xf32>
    %cst_66 = arith.constant 2.000000e+00 : f32
    %287 = vector.broadcast %cst_66 : f32 to vector<8x32xf32>
    %288 = arith.mulf %287, %286 : vector<8x32xf32>
    %cst_67 = arith.constant 1.000000e+00 : f32
    %289 = vector.broadcast %cst_67 : f32 to vector<8x32xf32>
    %290 = arith.subf %288, %289 : vector<8x32xf32>
    %291 = vector.extract_strided_slice %283 {offsets = [0, 96], sizes = [8, 32], strides = [1, 1]} : vector<8x128xf32> to vector<8x32xf32>
    %292 = arith.mulf %285, %237 : vector<8x32xf32>
    %293 = arith.mulf %284, %290 : vector<8x32xf32>
    %294 = arith.addf %292, %293 : vector<8x32xf32>
    %295 = math.tanh %294 : vector<8x32xf32>
    %296 = arith.mulf %291, %295 : vector<8x32xf32>
    %297 = vector.extract_strided_slice %268 {offsets = [0, 256], sizes = [8, 128], strides = [1, 1]} : vector<8x384xf32> to vector<8x128xf32>
    %298 = vector.extract_strided_slice %297 {offsets = [0, 0], sizes = [8, 32], strides = [1, 1]} : vector<8x128xf32> to vector<8x32xf32>
    %299 = vector.extract_strided_slice %297 {offsets = [0, 32], sizes = [8, 32], strides = [1, 1]} : vector<8x128xf32> to vector<8x32xf32>
    %300 = vector.extract_strided_slice %297 {offsets = [0, 64], sizes = [8, 32], strides = [1, 1]} : vector<8x128xf32> to vector<8x32xf32>
    %cst_68 = arith.constant 2.000000e+00 : f32
    %301 = vector.broadcast %cst_68 : f32 to vector<8x32xf32>
    %302 = arith.mulf %301, %300 : vector<8x32xf32>
    %cst_69 = arith.constant 1.000000e+00 : f32
    %303 = vector.broadcast %cst_69 : f32 to vector<8x32xf32>
    %304 = arith.subf %302, %303 : vector<8x32xf32>
    %305 = vector.extract_strided_slice %297 {offsets = [0, 96], sizes = [8, 32], strides = [1, 1]} : vector<8x128xf32> to vector<8x32xf32>
    %306 = arith.mulf %299, %251 : vector<8x32xf32>
    %307 = arith.mulf %298, %304 : vector<8x32xf32>
    %308 = arith.addf %306, %307 : vector<8x32xf32>
    %309 = math.tanh %308 : vector<8x32xf32>
    %310 = arith.mulf %305, %309 : vector<8x32xf32>
    %311 = tpu.concatenate %282, %296, %310 in 1 : vector<8x32xf32>, vector<8x32xf32>, vector<8x32xf32> -> vector<8x96xf32>
    %312 = arith.truncf %311 : vector<8x96xf32> to vector<8x96xbf16>
    %c16_70 = arith.constant 16 : index
    %c0_71 = arith.constant 0 : index
    %313 = vector.load %arg1[%c16_70, %c0_71] : memref<112x384xbf16, #tpu.memory_space<vmem>>, vector<96x384xbf16>
    %cst_72 = arith.constant dense<0.000000e+00> : vector<8x384xf32>
    %314 = tpu.matmul %312, %313, %cst_72 {dimension_numbers = #tpu.dot_dimension_numbers<[1], [0], [0], [1], [0, 0, 1, 1], [], []>} : vector<8x96xbf16>, vector<96x384xbf16>, vector<8x384xf32> -> vector<8x384xf32>
    %315 = vector.extract_strided_slice %314 {offsets = [0, 0], sizes = [8, 128], strides = [1, 1]} : vector<8x384xf32> to vector<8x128xf32>
    %c48 = arith.constant 48 : index
    %c0_73 = arith.constant 0 : index
    %316 = vector.load %arg4[%c48, %c0_73] : memref<64x128xf32, #tpu.memory_space<vmem>>, vector<8x128xf32>
    %317 = arith.addf %315, %316 : vector<8x128xf32>
    %318 = vector.extract_strided_slice %314 {offsets = [0, 128], sizes = [8, 256], strides = [1, 1]} : vector<8x384xf32> to vector<8x256xf32>
    %319 = arith.addf %318, %9 : vector<8x256xf32>
    %320 = tpu.concatenate %317, %319 in 1 : vector<8x128xf32>, vector<8x256xf32> -> vector<8x384xf32>
    %321 = arith.negf %320 : vector<8x384xf32>
    %322 = math.exp %321 : vector<8x384xf32>
    %cst_74 = arith.constant 1.000000e+00 : f32
    %323 = vector.broadcast %cst_74 : f32 to vector<8x384xf32>
    %324 = arith.addf %323, %322 : vector<8x384xf32>
    %325 = arith.divf %323, %324 : vector<8x384xf32>
    %326 = vector.extract_strided_slice %325 {offsets = [0, 0], sizes = [8, 128], strides = [1, 1]} : vector<8x384xf32> to vector<8x128xf32>
    %327 = vector.extract_strided_slice %326 {offsets = [0, 0], sizes = [8, 32], strides = [1, 1]} : vector<8x128xf32> to vector<8x32xf32>
    %328 = vector.extract_strided_slice %326 {offsets = [0, 32], sizes = [8, 32], strides = [1, 1]} : vector<8x128xf32> to vector<8x32xf32>
    %329 = vector.extract_strided_slice %326 {offsets = [0, 64], sizes = [8, 32], strides = [1, 1]} : vector<8x128xf32> to vector<8x32xf32>
    %cst_75 = arith.constant 2.000000e+00 : f32
    %330 = vector.broadcast %cst_75 : f32 to vector<8x32xf32>
    %331 = arith.mulf %330, %329 : vector<8x32xf32>
    %cst_76 = arith.constant 1.000000e+00 : f32
    %332 = vector.broadcast %cst_76 : f32 to vector<8x32xf32>
    %333 = arith.subf %331, %332 : vector<8x32xf32>
    %334 = vector.extract_strided_slice %326 {offsets = [0, 96], sizes = [8, 32], strides = [1, 1]} : vector<8x128xf32> to vector<8x32xf32>
    %335 = arith.mulf %328, %280 : vector<8x32xf32>
    %336 = arith.mulf %327, %333 : vector<8x32xf32>
    %337 = arith.addf %335, %336 : vector<8x32xf32>
    %338 = math.tanh %337 : vector<8x32xf32>
    %339 = arith.mulf %334, %338 : vector<8x32xf32>
    %340 = vector.extract_strided_slice %325 {offsets = [0, 128], sizes = [8, 128], strides = [1, 1]} : vector<8x384xf32> to vector<8x128xf32>
    %341 = vector.extract_strided_slice %340 {offsets = [0, 0], sizes = [8, 32], strides = [1, 1]} : vector<8x128xf32> to vector<8x32xf32>
    %342 = vector.extract_strided_slice %340 {offsets = [0, 32], sizes = [8, 32], strides = [1, 1]} : vector<8x128xf32> to vector<8x32xf32>
    %343 = vector.extract_strided_slice %340 {offsets = [0, 64], sizes = [8, 32], strides = [1, 1]} : vector<8x128xf32> to vector<8x32xf32>
    %cst_77 = arith.constant 2.000000e+00 : f32
    %344 = vector.broadcast %cst_77 : f32 to vector<8x32xf32>
    %345 = arith.mulf %344, %343 : vector<8x32xf32>
    %cst_78 = arith.constant 1.000000e+00 : f32
    %346 = vector.broadcast %cst_78 : f32 to vector<8x32xf32>
    %347 = arith.subf %345, %346 : vector<8x32xf32>
    %348 = vector.extract_strided_slice %340 {offsets = [0, 96], sizes = [8, 32], strides = [1, 1]} : vector<8x128xf32> to vector<8x32xf32>
    %349 = arith.mulf %342, %294 : vector<8x32xf32>
    %350 = arith.mulf %341, %347 : vector<8x32xf32>
    %351 = arith.addf %349, %350 : vector<8x32xf32>
    %352 = math.tanh %351 : vector<8x32xf32>
    %353 = arith.mulf %348, %352 : vector<8x32xf32>
    %354 = vector.extract_strided_slice %325 {offsets = [0, 256], sizes = [8, 128], strides = [1, 1]} : vector<8x384xf32> to vector<8x128xf32>
    %355 = vector.extract_strided_slice %354 {offsets = [0, 0], sizes = [8, 32], strides = [1, 1]} : vector<8x128xf32> to vector<8x32xf32>
    %356 = vector.extract_strided_slice %354 {offsets = [0, 32], sizes = [8, 32], strides = [1, 1]} : vector<8x128xf32> to vector<8x32xf32>
    %357 = vector.extract_strided_slice %354 {offsets = [0, 64], sizes = [8, 32], strides = [1, 1]} : vector<8x128xf32> to vector<8x32xf32>
    %cst_79 = arith.constant 2.000000e+00 : f32
    %358 = vector.broadcast %cst_79 : f32 to vector<8x32xf32>
    %359 = arith.mulf %358, %357 : vector<8x32xf32>
    %cst_80 = arith.constant 1.000000e+00 : f32
    %360 = vector.broadcast %cst_80 : f32 to vector<8x32xf32>
    %361 = arith.subf %359, %360 : vector<8x32xf32>
    %362 = vector.extract_strided_slice %354 {offsets = [0, 96], sizes = [8, 32], strides = [1, 1]} : vector<8x128xf32> to vector<8x32xf32>
    %363 = arith.mulf %356, %308 : vector<8x32xf32>
    %364 = arith.mulf %355, %361 : vector<8x32xf32>
    %365 = arith.addf %363, %364 : vector<8x32xf32>
    %366 = math.tanh %365 : vector<8x32xf32>
    %367 = arith.mulf %362, %366 : vector<8x32xf32>
    %368 = tpu.concatenate %339, %353, %367 in 1 : vector<8x32xf32>, vector<8x32xf32>, vector<8x32xf32> -> vector<8x96xf32>
    %369 = arith.truncf %368 : vector<8x96xf32> to vector<8x96xbf16>
    %c16_81 = arith.constant 16 : index
    %c0_82 = arith.constant 0 : index
    %370 = vector.load %arg1[%c16_81, %c0_82] : memref<112x384xbf16, #tpu.memory_space<vmem>>, vector<96x384xbf16>
    %cst_83 = arith.constant dense<0.000000e+00> : vector<8x384xf32>
    %371 = tpu.matmul %369, %370, %cst_83 {dimension_numbers = #tpu.dot_dimension_numbers<[1], [0], [0], [1], [0, 0, 1, 1], [], []>} : vector<8x96xbf16>, vector<96x384xbf16>, vector<8x384xf32> -> vector<8x384xf32>
    %372 = vector.extract_strided_slice %371 {offsets = [0, 0], sizes = [8, 128], strides = [1, 1]} : vector<8x384xf32> to vector<8x128xf32>
    %c56 = arith.constant 56 : index
    %c0_84 = arith.constant 0 : index
    %373 = vector.load %arg4[%c56, %c0_84] : memref<64x128xf32, #tpu.memory_space<vmem>>, vector<8x128xf32>
    %374 = arith.addf %372, %373 : vector<8x128xf32>
    %375 = vector.extract_strided_slice %371 {offsets = [0, 128], sizes = [8, 256], strides = [1, 1]} : vector<8x384xf32> to vector<8x256xf32>
    %376 = arith.addf %375, %9 : vector<8x256xf32>
    %377 = tpu.concatenate %374, %376 in 1 : vector<8x128xf32>, vector<8x256xf32> -> vector<8x384xf32>
    %378 = arith.negf %377 : vector<8x384xf32>
    %379 = math.exp %378 : vector<8x384xf32>
    %cst_85 = arith.constant 1.000000e+00 : f32
    %380 = vector.broadcast %cst_85 : f32 to vector<8x384xf32>
    %381 = arith.addf %380, %379 : vector<8x384xf32>
    %382 = arith.divf %380, %381 : vector<8x384xf32>
    %383 = vector.extract_strided_slice %382 {offsets = [0, 0], sizes = [8, 128], strides = [1, 1]} : vector<8x384xf32> to vector<8x128xf32>
    %384 = vector.extract_strided_slice %383 {offsets = [0, 0], sizes = [8, 32], strides = [1, 1]} : vector<8x128xf32> to vector<8x32xf32>
    %385 = vector.extract_strided_slice %383 {offsets = [0, 32], sizes = [8, 32], strides = [1, 1]} : vector<8x128xf32> to vector<8x32xf32>
    %386 = vector.extract_strided_slice %383 {offsets = [0, 64], sizes = [8, 32], strides = [1, 1]} : vector<8x128xf32> to vector<8x32xf32>
    %cst_86 = arith.constant 2.000000e+00 : f32
    %387 = vector.broadcast %cst_86 : f32 to vector<8x32xf32>
    %388 = arith.mulf %387, %386 : vector<8x32xf32>
    %cst_87 = arith.constant 1.000000e+00 : f32
    %389 = vector.broadcast %cst_87 : f32 to vector<8x32xf32>
    %390 = arith.subf %388, %389 : vector<8x32xf32>
    %391 = vector.extract_strided_slice %383 {offsets = [0, 96], sizes = [8, 32], strides = [1, 1]} : vector<8x128xf32> to vector<8x32xf32>
    %392 = arith.mulf %385, %337 : vector<8x32xf32>
    %393 = arith.mulf %384, %390 : vector<8x32xf32>
    %394 = arith.addf %392, %393 : vector<8x32xf32>
    %395 = math.tanh %394 : vector<8x32xf32>
    %396 = arith.mulf %391, %395 : vector<8x32xf32>
    %397 = vector.extract_strided_slice %382 {offsets = [0, 128], sizes = [8, 128], strides = [1, 1]} : vector<8x384xf32> to vector<8x128xf32>
    %398 = vector.extract_strided_slice %397 {offsets = [0, 0], sizes = [8, 32], strides = [1, 1]} : vector<8x128xf32> to vector<8x32xf32>
    %399 = vector.extract_strided_slice %397 {offsets = [0, 32], sizes = [8, 32], strides = [1, 1]} : vector<8x128xf32> to vector<8x32xf32>
    %400 = vector.extract_strided_slice %397 {offsets = [0, 64], sizes = [8, 32], strides = [1, 1]} : vector<8x128xf32> to vector<8x32xf32>
    %cst_88 = arith.constant 2.000000e+00 : f32
    %401 = vector.broadcast %cst_88 : f32 to vector<8x32xf32>
    %402 = arith.mulf %401, %400 : vector<8x32xf32>
    %cst_89 = arith.constant 1.000000e+00 : f32
    %403 = vector.broadcast %cst_89 : f32 to vector<8x32xf32>
    %404 = arith.subf %402, %403 : vector<8x32xf32>
    %405 = vector.extract_strided_slice %397 {offsets = [0, 96], sizes = [8, 32], strides = [1, 1]} : vector<8x128xf32> to vector<8x32xf32>
    %406 = arith.mulf %399, %351 : vector<8x32xf32>
    %407 = arith.mulf %398, %404 : vector<8x32xf32>
    %408 = arith.addf %406, %407 : vector<8x32xf32>
    %409 = math.tanh %408 : vector<8x32xf32>
    %410 = arith.mulf %405, %409 : vector<8x32xf32>
    %411 = vector.extract_strided_slice %382 {offsets = [0, 256], sizes = [8, 128], strides = [1, 1]} : vector<8x384xf32> to vector<8x128xf32>
    %412 = vector.extract_strided_slice %411 {offsets = [0, 0], sizes = [8, 32], strides = [1, 1]} : vector<8x128xf32> to vector<8x32xf32>
    %413 = vector.extract_strided_slice %411 {offsets = [0, 32], sizes = [8, 32], strides = [1, 1]} : vector<8x128xf32> to vector<8x32xf32>
    %414 = vector.extract_strided_slice %411 {offsets = [0, 64], sizes = [8, 32], strides = [1, 1]} : vector<8x128xf32> to vector<8x32xf32>
    %cst_90 = arith.constant 2.000000e+00 : f32
    %415 = vector.broadcast %cst_90 : f32 to vector<8x32xf32>
    %416 = arith.mulf %415, %414 : vector<8x32xf32>
    %cst_91 = arith.constant 1.000000e+00 : f32
    %417 = vector.broadcast %cst_91 : f32 to vector<8x32xf32>
    %418 = arith.subf %416, %417 : vector<8x32xf32>
    %419 = vector.extract_strided_slice %411 {offsets = [0, 96], sizes = [8, 32], strides = [1, 1]} : vector<8x128xf32> to vector<8x32xf32>
    %420 = arith.mulf %413, %365 : vector<8x32xf32>
    %421 = arith.mulf %412, %418 : vector<8x32xf32>
    %422 = arith.addf %420, %421 : vector<8x32xf32>
    %423 = math.tanh %422 : vector<8x32xf32>
    %424 = arith.mulf %419, %423 : vector<8x32xf32>
    %425 = tpu.concatenate %396, %410, %424 in 1 : vector<8x32xf32>, vector<8x32xf32>, vector<8x32xf32> -> vector<8x96xf32>
    %426 = arith.truncf %425 : vector<8x96xf32> to vector<8x96xbf16>
    %c16_92 = arith.constant 16 : index
    %c0_93 = arith.constant 0 : index
    %427 = vector.load %arg1[%c16_92, %c0_93] : memref<112x384xbf16, #tpu.memory_space<vmem>>, vector<96x384xbf16>
    %cst_94 = arith.constant dense<0.000000e+00> : vector<8x384xf32>
    %428 = tpu.matmul %426, %427, %cst_94 {dimension_numbers = #tpu.dot_dimension_numbers<[1], [0], [0], [1], [0, 0, 1, 1], [], []>} : vector<8x96xbf16>, vector<96x384xbf16>, vector<8x384xf32> -> vector<8x384xf32>
    %429 = vector.extract_strided_slice %428 {offsets = [0, 0], sizes = [8, 128], strides = [1, 1]} : vector<8x384xf32> to vector<8x128xf32>
    %430 = vector.extract_strided_slice %428 {offsets = [0, 128], sizes = [8, 256], strides = [1, 1]} : vector<8x384xf32> to vector<8x256xf32>
    %431 = arith.addf %430, %9 : vector<8x256xf32>
    %432 = tpu.concatenate %429, %431 in 1 : vector<8x128xf32>, vector<8x256xf32> -> vector<8x384xf32>
    %433 = arith.negf %432 : vector<8x384xf32>
    %434 = math.exp %433 : vector<8x384xf32>
    %cst_95 = arith.constant 1.000000e+00 : f32
    %435 = vector.broadcast %cst_95 : f32 to vector<8x384xf32>
    %436 = arith.addf %435, %434 : vector<8x384xf32>
    %437 = arith.divf %435, %436 : vector<8x384xf32>
    %438 = vector.extract_strided_slice %437 {offsets = [0, 128], sizes = [8, 128], strides = [1, 1]} : vector<8x384xf32> to vector<8x128xf32>
    %439 = vector.extract_strided_slice %438 {offsets = [0, 0], sizes = [8, 32], strides = [1, 1]} : vector<8x128xf32> to vector<8x32xf32>
    %440 = vector.extract_strided_slice %438 {offsets = [0, 32], sizes = [8, 32], strides = [1, 1]} : vector<8x128xf32> to vector<8x32xf32>
    %441 = vector.extract_strided_slice %438 {offsets = [0, 64], sizes = [8, 32], strides = [1, 1]} : vector<8x128xf32> to vector<8x32xf32>
    %cst_96 = arith.constant 2.000000e+00 : f32
    %442 = vector.broadcast %cst_96 : f32 to vector<8x32xf32>
    %443 = arith.mulf %442, %441 : vector<8x32xf32>
    %cst_97 = arith.constant 1.000000e+00 : f32
    %444 = vector.broadcast %cst_97 : f32 to vector<8x32xf32>
    %445 = arith.subf %443, %444 : vector<8x32xf32>
    %446 = vector.extract_strided_slice %438 {offsets = [0, 96], sizes = [8, 32], strides = [1, 1]} : vector<8x128xf32> to vector<8x32xf32>
    %447 = arith.mulf %440, %408 : vector<8x32xf32>
    %448 = arith.mulf %439, %445 : vector<8x32xf32>
    %449 = arith.addf %447, %448 : vector<8x32xf32>
    %450 = math.tanh %449 : vector<8x32xf32>
    %451 = arith.mulf %446, %450 : vector<8x32xf32>
    %452 = vector.extract_strided_slice %437 {offsets = [0, 256], sizes = [8, 128], strides = [1, 1]} : vector<8x384xf32> to vector<8x128xf32>
    %453 = vector.extract_strided_slice %452 {offsets = [0, 0], sizes = [8, 32], strides = [1, 1]} : vector<8x128xf32> to vector<8x32xf32>
    %454 = vector.extract_strided_slice %452 {offsets = [0, 32], sizes = [8, 32], strides = [1, 1]} : vector<8x128xf32> to vector<8x32xf32>
    %455 = vector.extract_strided_slice %452 {offsets = [0, 64], sizes = [8, 32], strides = [1, 1]} : vector<8x128xf32> to vector<8x32xf32>
    %cst_98 = arith.constant 2.000000e+00 : f32
    %456 = vector.broadcast %cst_98 : f32 to vector<8x32xf32>
    %457 = arith.mulf %456, %455 : vector<8x32xf32>
    %cst_99 = arith.constant 1.000000e+00 : f32
    %458 = vector.broadcast %cst_99 : f32 to vector<8x32xf32>
    %459 = arith.subf %457, %458 : vector<8x32xf32>
    %460 = vector.extract_strided_slice %452 {offsets = [0, 96], sizes = [8, 32], strides = [1, 1]} : vector<8x128xf32> to vector<8x32xf32>
    %461 = arith.mulf %454, %422 : vector<8x32xf32>
    %462 = arith.mulf %453, %459 : vector<8x32xf32>
    %463 = arith.addf %461, %462 : vector<8x32xf32>
    %464 = math.tanh %463 : vector<8x32xf32>
    %465 = arith.mulf %460, %464 : vector<8x32xf32>
    %466 = tpu.concatenate %396, %451, %465 in 1 : vector<8x32xf32>, vector<8x32xf32>, vector<8x32xf32> -> vector<8x96xf32>
    %467 = arith.truncf %466 : vector<8x96xf32> to vector<8x96xbf16>
    %c16_100 = arith.constant 16 : index
    %c0_101 = arith.constant 0 : index
    %468 = vector.load %arg1[%c16_100, %c0_101] : memref<112x384xbf16, #tpu.memory_space<vmem>>, vector<96x384xbf16>
    %cst_102 = arith.constant dense<0.000000e+00> : vector<8x384xf32>
    %469 = tpu.matmul %467, %468, %cst_102 {dimension_numbers = #tpu.dot_dimension_numbers<[1], [0], [0], [1], [0, 0, 1, 1], [], []>} : vector<8x96xbf16>, vector<96x384xbf16>, vector<8x384xf32> -> vector<8x384xf32>
    %470 = vector.extract_strided_slice %469 {offsets = [0, 0], sizes = [8, 128], strides = [1, 1]} : vector<8x384xf32> to vector<8x128xf32>
    %471 = vector.extract_strided_slice %469 {offsets = [0, 128], sizes = [8, 256], strides = [1, 1]} : vector<8x384xf32> to vector<8x256xf32>
    %472 = arith.addf %471, %9 : vector<8x256xf32>
    %473 = tpu.concatenate %470, %472 in 1 : vector<8x128xf32>, vector<8x256xf32> -> vector<8x384xf32>
    %474 = arith.negf %473 : vector<8x384xf32>
    %475 = math.exp %474 : vector<8x384xf32>
    %cst_103 = arith.constant 1.000000e+00 : f32
    %476 = vector.broadcast %cst_103 : f32 to vector<8x384xf32>
    %477 = arith.addf %476, %475 : vector<8x384xf32>
    %478 = arith.divf %476, %477 : vector<8x384xf32>
    %479 = vector.extract_strided_slice %478 {offsets = [0, 256], sizes = [8, 128], strides = [1, 1]} : vector<8x384xf32> to vector<8x128xf32>
    %480 = vector.extract_strided_slice %479 {offsets = [0, 0], sizes = [8, 32], strides = [1, 1]} : vector<8x128xf32> to vector<8x32xf32>
    %481 = vector.extract_strided_slice %479 {offsets = [0, 32], sizes = [8, 32], strides = [1, 1]} : vector<8x128xf32> to vector<8x32xf32>
    %482 = vector.extract_strided_slice %479 {offsets = [0, 64], sizes = [8, 32], strides = [1, 1]} : vector<8x128xf32> to vector<8x32xf32>
    %cst_104 = arith.constant 2.000000e+00 : f32
    %483 = vector.broadcast %cst_104 : f32 to vector<8x32xf32>
    %484 = arith.mulf %483, %482 : vector<8x32xf32>
    %cst_105 = arith.constant 1.000000e+00 : f32
    %485 = vector.broadcast %cst_105 : f32 to vector<8x32xf32>
    %486 = arith.subf %484, %485 : vector<8x32xf32>
    %487 = vector.extract_strided_slice %479 {offsets = [0, 96], sizes = [8, 32], strides = [1, 1]} : vector<8x128xf32> to vector<8x32xf32>
    %488 = arith.mulf %481, %463 : vector<8x32xf32>
    %489 = arith.mulf %480, %486 : vector<8x32xf32>
    %490 = arith.addf %488, %489 : vector<8x32xf32>
    %491 = math.tanh %490 : vector<8x32xf32>
    %492 = arith.mulf %487, %491 : vector<8x32xf32>
    %c0_106 = arith.constant 0 : index
    %c0_107 = arith.constant 0 : index
    %493 = vector.load %arg2[%c0_106, %c0_107] : memref<40x384xf32, #tpu.memory_space<vmem>>, vector<32x128xf32>
    %cst_108 = arith.constant dense<0.000000e+00> : vector<8x128xf32>
    %494 = tpu.matmul %492, %493, %cst_108 {dimension_numbers = #tpu.dot_dimension_numbers<[1], [0], [0], [1], [0, 0, 1, 1], [], []>} : vector<8x32xf32>, vector<32x128xf32>, vector<8x128xf32> -> vector<8x128xf32>
    %c33 = arith.constant 33 : index
    %c0_109 = arith.constant 0 : index
    %495 = vector.load %arg2[%c33, %c0_109] : memref<40x384xf32, #tpu.memory_space<vmem>>, vector<1x128xf32>
    %496 = vector.broadcast %495 : vector<1x128xf32> to vector<8x128xf32>
    %497 = arith.addf %494, %496 : vector<8x128xf32>
    %c0_110 = arith.constant 0 : index
    %c0_111 = arith.constant 0 : index
    %498 = vector.load %arg3[%c0_110, %c0_111] : memref<8x128xf32, #tpu.memory_space<vmem>>, vector<8x128xf32>
    tpu.vector_store %arg3[%c0_110, %c0_111], %497 {strides = array<i32>} : memref<8x128xf32, #tpu.memory_space<vmem>>, vector<8x128xf32>,
    return
  }
}

</mosaic_0001>

<bundles_post_ra>
// kernel: tpu_custom_call.1
= control target key start
LH: loop header
LB: loop body
LE: loop exit
PB: predicated region body
PF: predicated region fallthrough
CT: control target
= control target key end

     0   :  { %8 = vsyncpa [#allocation4], 0  ;;  %s3083_s0 = inlined_call_operand.vmem [shape: bf16[64,16], index: 0, kind: input, shape index: {}]   ;;  %s3084_s1 = inlined_call_operand.hbm [shape: bf16[112,384], index: 1, kind: input, shape index: {}]   ;;  %s3085_s2 = inlined_call_operand.hbm [shape: f32[40,384], index: 2, kind: input, shape index: {}]   ;;  %s3086_s3 = inlined_call_operand.hbm [shape: f32[8,128], index: 3, kind: output, shape index: {}]  }
   0x1   :  { %9 = vsyncpa [#allocation7], 0 }
   0x2   :  { %10 = vsyncpa [#allocation5], 0  ;;  %s2448_s12 = smov [#allocation3]  }
   0x3   :  { %s18_s13 = sshll.u32 %s2448_s12, 4  ;;  %s19_s13 = int_to_ptr.vmem [resolvable:$true] %s18_s13 }
   0x4   :  { %s2390_s14 = scalar_lea.vmem %s19_s13, 2688  ;;  %p2395_p1 = scmp.lt.s32.totalorder %s19_s13, %s19_s13 }
   0x5   :  { %p2391_p0 = scmp.ne.s32.totalorder %s19_s13, %s2390_s14  ;;  %p2396_p2 = scmp.lt.s32.totalorder %s2390_s14, %s2390_s14 }
   0x7   :  { %p2397_p3 = por %p2396_p2, %p2395_p1 }
   0x9   :  { %p2398_p4 = pnand %p2397_p3, %p2391_p0 }
   0xb   :  { %2401 = shalt.err (!%p2398_p4)
}
   0xc   :  { %s2449_s15 = smov 192   ;;  %s2450_s16 = smov 12  }
   0xd   :  { %24 = dma.hbm_to_vmem [thread:$0]  %s3084_s1, 2688, %s19_s13, [#allocation4], %s2449_s15, %s2449_s15, %s2450_s16  }
   0xe   :  { %s2451_s19 = smov [#allocation6]  }
   0xf   :  { %s30_s20 = sshll.u32 %s2451_s19, 4  ;;  %s31_s20 = int_to_ptr.vmem [resolvable:$true] %s30_s20 }
  0x10   :  { %s2410_s21 = scalar_lea.vmem %s31_s20, 1920  ;;  %p2415_p6 = scmp.lt.s32.totalorder %s31_s20, %s31_s20 }
  0x11   :  { %p2411_p5 = scmp.ne.s32.totalorder %s31_s20, %s2410_s21  ;;  %p2416_p7 = scmp.lt.s32.totalorder %s2410_s21, %s2410_s21 }
  0x13   :  { %p2417_p8 = por %p2416_p7, %p2415_p6 }
  0x15   :  { %p2418_p9 = pnand %p2417_p8, %p2411_p5 }
  0x17   :  { %2421 = shalt.err (!%p2418_p9)
}
  0x18   :  { %s2452_s22 = smov 384   ;;  %s2453_s23 = smov 24  }
  0x19   :  { %36 = dma.hbm_to_vmem [thread:$0]  %s3085_s2, 1920, %s31_s20, [#allocation7], %s2452_s22, %s2452_s22, %s2453_s23  }
  0x1a   :  { %2442 = dma.done.wait [#allocation4], 2688  }
  0x1b   :  { %2443 = vsyncadd [#allocation4], 4294964608 }
  0x1c   :  { %2444 = dma.done.wait [#allocation7], 1920  }
  0x1d   :  { %2445 = vsyncadd [#allocation7], 4294965376  ;;  %v2454_v0 = vmov 0   ;;  %v2489_v1 = vld [vmem:[#allocation3 + $0x94] ss:$12 sps:$4 sm:$0xff]   ;;  %vm81_vm0 = vcmask 130048   ;;  %v170_v49 = vlaneseq }
  0x1e   :  { %301 = vmatprep.mubr.bf16.mxu1 %v2454_v0  ;;  %v2491_v2 = vld [vmem:[#allocation3 + $0x90] ss:$12 sps:$4 sm:$0xff]   ;;  %273 = vmatprep.subr.bf16.mxu1 %v2489_v1  ;;  %v2497_v4 = vld [vmem:[#allocation3 + $0x78] ss:$12 sps:$4 sm:$0xff]   ;;  %v2199_v6 = vld [vmem:[#allocation3] ss:$12 sps:$4 sm:$0xff]  }
  0x1f   :  { %v2494_v3 = vld [vmem:[#allocation3 + $0x7c] ss:$12 sps:$4 sm:$0xff]   ;;  %274 = vmatpush1.bf16.msra.mxu1 %v2491_v2  ;;  %v2499_v5 = vld [vmem:[#allocation3 + $0x64] ss:$12 sps:$4 sm:$0xff]   ;;  %v2502_v7 = vld [vmem:[#allocation3 + $0x60] ss:$12 sps:$4 sm:$0xff]   ;;  %2027 = vmatprep.subr.bf16.mxu0 %v2199_v6 }
  0x20   :  { %275 = vmatprep.subr.bf16.mxu1 %v2494_v3  ;;  %v2202_v8 = vld [vmem:[%s3083_s0] sm:$0xff]   ;;  %2028 = vmatpush3.bf16.msra.mxu0 %v2199_v6  ;;  %v2508_v9 = vld [vmem:[#allocation3 + $0x4c] ss:$12 sps:$4 sm:$0xff]   ;;  %v2516_v11 = vld [vmem:[#allocation3 + $0x48] ss:$12 sps:$4 sm:$0xff]   ;;  %v2455_v16 = vmov 0.0|0.0  }
  0x21   :  { %2029 = vmatprep.mubr.msk.bf16.mxu0 %vm81_vm0, %v2202_v8  ;;  %v2204_v10 = vld [vmem:[%s3083_s0 + $0x8] sm:$0xff]   ;;  %352 = vmatprep.subr.bf16.mxu0 %v2489_v1  ;;  %v2519_v12 = vld [vmem:[#allocation3 + $0x34] ss:$12 sps:$4 sm:$0xff]   ;;  %v2525_v13 = vld [vmem:[#allocation3 + $0x30] ss:$12 sps:$4 sm:$0xff]   ;;  %s2456_s28 = smov 64  }
  0x22   :  { %v2530_v14 = vld [vmem:[#allocation3 + $0x1c] ss:$12 sps:$4 sm:$0xff]   ;;  %v2534_v15 = vld [vmem:[#allocation3 + $0x18] ss:$12 sps:$4 sm:$0xff]   ;;  %s2457_s29 = smov 32   ;;  %v2211_v37 = vld [vmem:[%s3083_s0 + $0x10] sm:$0xff]  }
  0x23   :  { %276 = vmatpush1.bf16.msra.mxu1 %v2497_v4  ;;  %2030 = vmatmul.mubr.msk.bf16.vlgmr.msra.gmra.mxu0 %vm81_vm0, %v2204_v10  ;;  %v2561_v18 = vld [vmem:[#allocation6 + $0x60] ss:$0 sm:$0xff]  ;;  %v2212_v38 = vld [vmem:[%s3083_s0 + $0x18] sm:$0xff]   ;;  %vm340_vm1 = vcmask 261120   ;;  %vm342_vm2 = vcmask 523264   ;;  %vm265_vm3 = vcmask 785408  }
  0x24   :  { %277 = vmatprep.subr.bf16.mxu1 %v2499_v5  ;;  %353 = vmatpush1.bf16.msra.mxu0 %v2491_v2  ;;  %v2586_v51 = vshrl.u32 %v170_v49, 7  ;;  %v2591_v54 = vld [vmem:[#allocation6 + $0x68] ss:$8 sm:$0x3]  ;;  %vm2459_vm4 = vmmov 0   ;;  %s2460_s0 = smov 96  }
  0x25   :  { %354 = vmatprep.subr.bf16.mxu0 %v2494_v3  ;;  %2033 = vmatprep.mubr.msk.bf16.mxu0 %vm81_vm0, %v2211_v37  ;;  %s2461_s7 = smov [#allocation8]  }
  0x26   :  { %v172_v53 = vsub.s32 0, %v2586_v51  ;;  %s1859_s8 = sshll.u32 %s2461_s7, 4  ;;  %s1860_s8 = int_to_ptr.vmem [resolvable:$true] %s1859_s8 }
  0x27   :  { %278 = vmatpush1.bf16.msra.mxu1 %v2502_v7  ;;  %s2422_s9 = scalar_lea.vmem %s1860_s8, 128  ;;  %p2427_p11 = scmp.lt.s32.totalorder %s1860_s8, %s1860_s8 }
  0x28   :  { %279 = vmatprep.subr.bf16.mxu1 %v2508_v9  ;;  %355 = vmatpush1.bf16.msra.mxu0 %v2497_v4  ;;  %v2597_v57 = vrot.slane %v2591_v54, %v172_v53  ;;  %p2423_p10 = scmp.ne.s32.totalorder %s1860_s8, %s2422_s9  ;;  %p2428_p12 = scmp.lt.s32.totalorder %s2422_s9, %s2422_s9 }
  0x29   :  { %356 = vmatprep.subr.bf16.mxu0 %v2499_v5 }
  0x2a   :  { %p2429_p13 = por %p2428_p12, %p2427_p11 }
  0x2b   :  { %280 = vmatpush1.bf16.msra.mxu1 %v2516_v11  ;;  %2034 = vmatmul.mubr.msk.bf16.gmra.mxu0 %vm81_vm0, %v2212_v38  ;;  %v2610_v38 = vld [vmem:[#allocation3 + $0x98] ss:$12 sps:$4 sm:$0xff]  }
  0x2c   :  { %281 = vmatprep.subr.bf16.mxu1 %v2519_v12  ;;  %357 = vmatpush1.bf16.msra.mxu0 %v2502_v7  ;;  %p2430_p0 = pnand %p2429_p13, %p2423_p10 }
  0x2d   :  { %358 = vmatprep.subr.bf16.mxu0 %v2508_v9  ;;  %380 = vmatprep.mubr.bf16.mxu0 %v2454_v0 }
  0x2f   :  { %282 = vmatpush1.bf16.msra.mxu1 %v2525_v13 }
  0x30   :  { %283 = vmatprep.subr.bf16.mxu1 %v2530_v14  ;;  %359 = vmatpush1.bf16.msra.mxu0 %v2516_v11 }
  0x31   :  { %360 = vmatprep.subr.bf16.mxu0 %v2519_v12 }
  0x33   :  { %284 = vmatpush1.bf16.msra.mxu1 %v2534_v15 }
  0x34   :  { %496 = vmatprep.subr.bf16.mxu1 %v2489_v1  ;;  %361 = vmatpush1.bf16.msra.mxu0 %v2525_v13 }
  0x35   :  { %362 = vmatprep.subr.bf16.mxu0 %v2530_v14 }
  0x36   :  { %302 = vmatmul.mubr.bf16.vlgmr.msra.gmra.mxu1 %v2455_v16 }
  0x37   :  { %497 = vmatpush1.bf16.msra.mxu1 %v2491_v2  ;;  %524 = vmatprep.mubr.bf16.mxu1 %v2454_v0 }
  0x38   :  { %498 = vmatprep.subr.bf16.mxu1 %v2494_v3  ;;  %363 = vmatpush1.bf16.msra.mxu0 %v2534_v15 }
  0x3b   :  { %499 = vmatpush1.bf16.msra.mxu1 %v2497_v4 }
  0x3c   :  { %500 = vmatprep.subr.bf16.mxu1 %v2499_v5 }
  0x3f   :  { %501 = vmatpush1.bf16.msra.mxu1 %v2502_v7 }
  0x40   :  { %502 = vmatprep.subr.bf16.mxu1 %v2508_v9 }
  0x43   :  { %503 = vmatpush1.bf16.msra.mxu1 %v2516_v11 }
  0x44   :  { %504 = vmatprep.subr.bf16.mxu1 %v2519_v12 }
  0x47   :  { %505 = vmatpush1.bf16.msra.mxu1 %v2525_v13 }
  0x48   :  { %506 = vmatprep.subr.bf16.mxu1 %v2530_v14 }
  0x4b   :  { %507 = vmatpush1.bf16.msra.mxu1 %v2534_v15 }
  0x4c   :  { %674 = vmatprep.subr.bf16.mxu1 %v2489_v1 }
  0xe3   :  { %v2559_v17 = vpop.f32.mrf.mxu0 }
  0xe5   :  { %v128_v19 = vpop.f32.mrf.mxu0 }
  0xe6   :  { %v129_v20 = vadd.f32 %v128_v19, %v2561_v18 }
  0xe7   :  { %v2580_v46 = vpop.f32.mrf.mxu0 }
  0xe9   :  { %v131_v47 = vpop.f32.mrf.mxu0 }
  0xea   :  { %v132_v56 = vadd.f32 %v131_v47, %v2561_v18 }
  0xeb   :  { %v2582_v48 = vpop.f32.mrf.mxu0 }
  0xed   :  { %v2584_v50 = vpop.f32.mrf.mxu0 }
  0xef   :  { %v2588_v52 = vpop.f32.mrf.mxu0 }
  0xf1   :  { %v2593_v55 = vpop.f32.mrf.mxu0 }
  0xf6   :  { %v303_v21 = vpop.f32.mrf.mxu1 }
  0xf7   :  { %v310_v22 = vadd.f32 %v303_v21, %v129_v20 }
  0xf8   :  { %v305_v23 = vpop.f32.mrf.mxu1 }
  0xf9   :  { %v1890_v24 = vmul.f32 -1.442695, %v310_v22 }
  0xfa   :  { %v306_v25 = vpop.f32.mrf.mxu1 }
  0xfb   :  { %2219 = vpow2.f32 %v1890_v24 }
  0xfc   :  { %v307_v26 = vpop.f32.mrf.mxu1 }
 0x108   :  { %v2220_v27 = vpop.eup %2219 }
 0x109   :  { %v314_v28 = vadd.f32 1.0, %v2220_v27 }
 0x10b   :  { %2221 = vrcp.f32 %v314_v28 }
 0x118   :  { %v2222_v29 = vpop.eup %2221 }
 0x119   :  { %v317_v30 = vmul.f32 2.0, %v2222_v29  ;;  %v319_v34 = vmul.f32 0.0, %v2222_v29 }
 0x11b   :  { %v1891_v31 = vadd.f32 -1.0, %v317_v30 }
 0x11d   :  { %321 = vrot.lane.b32.xlu0 %v1891_v31, %s2456_s28 }
 0x18f   :  { %v322_v32 = vpop.permute.xlu0 %321 }
 0x190   :  { %v324_v33 = vmul.f32 %v2222_v29, %v322_v32 }
 0x192   :  { %326 = vrot.lane.b32.xlu0 %v324_v33, %s2457_s29 }
 0x204   :  { %v327_v35 = vpop.permute.xlu0 %326 }
 0x205   :  { %v329_v36 = vadd.f32 %v327_v35, %v319_v34 }
 0x207   :  { %2223 = vtanh.f32 %v329_v36 }
 0x214   :  { %v2224_v39 = vpop.eup %2223 }
 0x215   :  { %332 = vrot.lane.b32.xlu1 %v2224_v39, %s2456_s28  ;;  %v2458_v39 = vmov 0.0  }
 0x216   :  { %2037 = vmatprep.subr.bf16.mxu0 %v2458_v39 }
 0x287   :  { %v333_v40 = vpop.permute.xlu1 %332 }
 0x288   :  { %v335_v41 = vmul.f32 %v2222_v29, %v333_v40  ;;  %v2614_v40 = vld [vmem:[#allocation3 + $0x80] ss:$12 sps:$4 sm:$0xff]  }
 0x28a   :  { %337 = vrot.lane.b32.xlu1 %v335_v41, %s2457_s29 }
 0x2fc   :  { %v338_v42 = vpop.permute.xlu1 %337 }
 0x2fd   :  { %v341_v43 = vsel %vm340_vm1, %v338_v42, 0.0 }
 0x2fe   :  { %v343_v44 = vsel %vm342_vm2, %v341_v43, 0.0  ;;  %v2623_v43 = vld [vmem:[#allocation3 + $0x50] ss:$12 sps:$4 sm:$0xff]  }
 0x2ff   :  { %v344_v45 = vpack.c.bf16 %v343_v44, %v343_v44  ;;  %v2628_v44 = vld [vmem:[#allocation3 + $0x38] ss:$12 sps:$4 sm:$0xff]  }
 0x301   :  { %1892 = vmatmul.mubr.msk.bf16.vlgmr.msra.gmra.mxu0 %vm265_vm3, %v344_v45  ;;  %v2633_v45 = vld [vmem:[#allocation3 + $0x20] ss:$12 sps:$4 sm:$0xff]  }
 0x302   :  { %2038 = vmatpush3.bf16.msra.mxu0 %v2610_v38  ;;  %2049 = vmatprep.mubr.msk.bf16.mxu0 %vm2459_vm4, %v2458_v39 }
 0x303   :  { %2039 = vmatprep.subr.bf16.mxu0 %v2458_v39 }
 0x306   :  { %2040 = vmatpush3.bf16.msra.mxu0 %v2614_v40 }
 0x307   :  { %2041 = vmatprep.subr.bf16.mxu0 %v2458_v39 }
 0x3c1   :  { %v382_v58 = vpop.f32.mrf.mxu0 }
 0x3c2   :  { %v390_v59 = vadd.f32 %v382_v58, %v132_v56 }
 0x3c3   :  { %v384_v60 = vpop.f32.mrf.mxu0 }
 0x3c4   :  { %v1893_v61 = vmul.f32 -1.442695, %v390_v59  ;;  %v391_v62 = vadd.f32 %v384_v60, %v2597_v57 }
 0x3c5   :  { %v386_v63 = vpop.f32.mrf.mxu0 }
 0x3c6   :  { %2225 = vpow2.f32 %v1893_v61  ;;  %v1894_v6 = vmul.f32 -1.442695, %v391_v62  ;;  %v176_v63 = vsub.s32 1, %v2586_v51 }
 0x3c7   :  { %v387_v8 = vpop.f32.mrf.mxu0 }
 0x3c8   :  { %2227 = vpow2.f32 %v1894_v6  ;;  %v2674_v6 = vrot.slane %v2591_v54, %v176_v63  ;;  %v137_v8 = vadd.f32 %v2559_v17, %v2561_v18 }
 0x3d3   :  { %v2226_v10 = vpop.eup %2225 }
 0x3d4   :  { %v398_v16 = vadd.f32 1.0, %v2226_v10 }
 0x3d5   :  { %v2228_v19 = vpop.eup %2227 }
 0x3d6   :  { %2229 = vrcp.f32 %v398_v16  ;;  %v399_v20 = vadd.f32 1.0, %v2228_v19 }
 0x3d8   :  { %2231 = vrcp.f32 %v399_v20 }
 0x3e3   :  { %v2230_v21 = vpop.eup %2229 }
 0x3e4   :  { %v404_v22 = vmul.f32 2.0, %v2230_v21  ;;  %v406_v31 = vmul.f32 %v2230_v21, %v329_v36  ;;  %v2618_v36 = vld [vmem:[#allocation3 + $0x68] ss:$12 sps:$4 sm:$0xff]  }
 0x3e5   :  { %v2232_v23 = vpop.eup %2231  ;;  %2042 = vmatpush3.bf16.msra.mxu0 %v2618_v36 }
 0x3e6   :  { %v1895_v24 = vadd.f32 -1.0, %v404_v22  ;;  %v423_v25 = vmul.f32 2.0, %v2232_v23  ;;  %v425_v34 = vmul.f32 0.0, %v2232_v23  ;;  %2043 = vmatprep.subr.bf16.mxu0 %v2458_v39 }
 0x3e8   :  { %408 = vrot.lane.b32.xlu0 %v1895_v24, %s2456_s28  ;;  %v1896_v26 = vadd.f32 -1.0, %v423_v25 }
 0x3e9   :  { %2044 = vmatpush3.bf16.msra.mxu0 %v2623_v43 }
 0x3ea   :  { %427 = vrot.lane.b32.xlu1 %v1896_v26, %s2456_s28  ;;  %2045 = vmatprep.subr.bf16.mxu0 %v2458_v39 }
 0x3ed   :  { %2046 = vmatpush3.bf16.msra.mxu0 %v2628_v44 }
 0x3ee   :  { %2047 = vmatprep.subr.bf16.mxu0 %v2458_v39 }
 0x3f1   :  { %2048 = vmatpush3.bf16.msra.mxu0 %v2633_v45 }
 0x3f2   :  { %2053 = vmatprep.subr.bf16.mxu0 %v2458_v39 }
 0x45a   :  { %v409_v27 = vpop.permute.xlu0 %408 }
 0x45b   :  { %v411_v28 = vmul.f32 %v2230_v21, %v409_v27 }
 0x45c   :  { %v428_v29 = vpop.permute.xlu1 %427 }
 0x45d   :  { %v430_v30 = vmul.f32 %v2232_v23, %v428_v29  ;;  %413 = vrot.lane.b32.xlu0 %v411_v28, %s2457_s29 }
 0x45f   :  { %432 = vrot.lane.b32.xlu1 %v430_v30, %s2457_s29 }
 0x4cf   :  { %v414_v32 = vpop.permute.xlu0 %413 }
 0x4d0   :  { %v2604_v33 = vadd.f32 %v414_v32, %v406_v31 }
 0x4d1   :  { %v433_v35 = vpop.permute.xlu1 %432 }
 0x4d2   :  { %2233 = vtanh.f32 %v2604_v33  ;;  %v2607_v37 = vadd.f32 %v433_v35, %v425_v34 }
 0x4d4   :  { %2235 = vtanh.f32 %v2607_v37 }
 0x4df   :  { %v2234_v41 = vpop.eup %2233 }
 0x4e0   :  { %419 = vrot.lane.b32.xlu0 %v2234_v41, %s2456_s28 }
 0x4e1   :  { %v2236_v42 = vpop.eup %2235 }
 0x4e2   :  { %438 = vrot.lane.b32.xlu1 %v2236_v42, %s2456_s28 }
 0x552   :  { %v420_v47 = vpop.permute.xlu0 %419 }
 0x553   :  { %v422_v49 = vmul.f32 %v2230_v21, %v420_v47 }
 0x554   :  { %v439_v53 = vpop.permute.xlu1 %438 }
 0x555   :  { %v441_v56 = vmul.f32 %v2232_v23, %v439_v53  ;;  %443 = vrot.lane.b32.xlu0 %v422_v49, %s2457_s29 }
 0x557   :  { %447 = vrot.lane.b32.xlu1 %v441_v56, %s2456_s28 }
 0x5c7   :  { %v444_v58 = vpop.permute.xlu0 %443 }
 0x5c9   :  { %v448_v59 = vpop.permute.xlu1 %447 }
 0x5ca   :  { %v450_v60 = vsel %vm340_vm1, %v444_v58, %v448_v59 }
 0x5cb   :  { %v451_v61 = vsel %vm342_vm2, %v450_v60, 0.0 }
 0x5cc   :  { %v452_v62 = vpack.c.bf16 %v451_v61, %v451_v61 }
 0x5ce   :  { %1903 = vmatmul.mubr.msk.bf16.vlgmr.msra.gmra.mxu1 %vm265_vm3, %v452_v62  ;;  %2050 = vmatmul.mubr.msk.bf16.vlgmr.msra.gmra.mxu0 %vm265_vm3, %v452_v62 }
 0x5cf   :  { %675 = vmatpush1.bf16.msra.mxu1 %v2491_v2  ;;  %2054 = vmatpush3.bf16.msra.mxu0 %v2610_v38 }
 0x5d0   :  { %676 = vmatprep.subr.bf16.mxu1 %v2494_v3  ;;  %2055 = vmatprep.subr.bf16.mxu0 %v2458_v39 }
 0x5d1   :  { %702 = vmatprep.mubr.bf16.mxu1 %v2454_v0  ;;  %2065 = vmatprep.mubr.msk.bf16.mxu0 %vm2459_vm4, %v2458_v39 }
 0x5d3   :  { %677 = vmatpush1.bf16.msra.mxu1 %v2497_v4  ;;  %2056 = vmatpush3.bf16.msra.mxu0 %v2614_v40 }
 0x5d4   :  { %678 = vmatprep.subr.bf16.mxu1 %v2499_v5  ;;  %2057 = vmatprep.subr.bf16.mxu0 %v2458_v39 }
 0x5d7   :  { %679 = vmatpush1.bf16.msra.mxu1 %v2502_v7  ;;  %2058 = vmatpush3.bf16.msra.mxu0 %v2618_v36 }
 0x5d8   :  { %680 = vmatprep.subr.bf16.mxu1 %v2508_v9  ;;  %2059 = vmatprep.subr.bf16.mxu0 %v2458_v39 }
 0x5db   :  { %681 = vmatpush1.bf16.msra.mxu1 %v2516_v11  ;;  %2060 = vmatpush3.bf16.msra.mxu0 %v2623_v43 }
 0x5dc   :  { %682 = vmatprep.subr.bf16.mxu1 %v2519_v12  ;;  %2061 = vmatprep.subr.bf16.mxu0 %v2458_v39 }
 0x5df   :  { %683 = vmatpush1.bf16.msra.mxu1 %v2525_v13  ;;  %2062 = vmatpush3.bf16.msra.mxu0 %v2628_v44 }
 0x5e0   :  { %684 = vmatprep.subr.bf16.mxu1 %v2530_v14  ;;  %2063 = vmatprep.subr.bf16.mxu0 %v2458_v39 }
 0x5e3   :  { %685 = vmatpush1.bf16.msra.mxu1 %v2534_v15  ;;  %2064 = vmatpush3.bf16.msra.mxu0 %v2633_v45 }
 0x5e4   :  { %852 = vmatprep.subr.bf16.mxu1 %v2489_v1  ;;  %2069 = vmatprep.subr.bf16.mxu0 %v2458_v39 }
 0x68e   :  { %v526_v10 = vpop.f32.mrf.mxu1  ;;  %v567_v16 = vpop.f32.mrf.mxu0 }
 0x68f   :  { %v574_v19 = vadd.f32 %v526_v10, %v137_v8  ;;  %v576_v20 = vadd.f32 %v567_v16, %v2674_v6 }
 0x690   :  { %v528_v21 = vpop.f32.mrf.mxu1  ;;  %v2051_v22 = vpop.f32.mrf.mxu0 }
 0x691   :  { %v1905_v23 = vmul.f32 -1.442695, %v574_v19  ;;  %v1907_v24 = vmul.f32 -1.442695, %v576_v20  ;;  %v575_v25 = vadd.f32 %v528_v21, %v2597_v57 }
 0x692   :  { %v530_v26 = vpop.f32.mrf.mxu1  ;;  %v570_v27 = vpop.f32.mrf.mxu0 }
 0x693   :  { %2237 = vpow2.f32 %v1905_v23  ;;  %v1906_v51 = vmul.f32 -1.442695, %v575_v25 }
 0x694   :  { %2239 = vpow2.f32 %v1907_v24  ;;  %v531_v54 = vpop.f32.mrf.mxu1  ;;  %v2052_v28 = vpop.f32.mrf.mxu0 }
 0x695   :  { %2241 = vpow2.f32 %v1906_v51 }
 0x6a0   :  { %v2238_v17 = vpop.eup %2237 }
 0x6a1   :  { %v2240_v29 = vpop.eup %2239  ;;  %v586_v30 = vadd.f32 1.0, %v2238_v17 }
 0x6a2   :  { %v2242_v31 = vpop.eup %2241  ;;  %v588_v32 = vadd.f32 1.0, %v2240_v29 }
 0x6a3   :  { %2243 = vrcp.f32 %v586_v30  ;;  %v587_v34 = vadd.f32 1.0, %v2242_v31 }
 0x6a4   :  { %2245 = vrcp.f32 %v588_v32 }
 0x6a5   :  { %2247 = vrcp.f32 %v587_v34 }
 0x6b0   :  { %v2244_v35 = vpop.eup %2243 }
 0x6b1   :  { %v2246_v41 = vpop.eup %2245  ;;  %v595_v42 = vmul.f32 2.0, %v2244_v35  ;;  %v597_v16 = vmul.f32 %v2244_v35, %v2604_v33 }
 0x6b2   :  { %v2248_v47 = vpop.eup %2247  ;;  %v633_v56 = vmul.f32 2.0, %v2246_v41  ;;  %v635_v24 = vmul.f32 0.0, %v2246_v41 }
 0x6b3   :  { %v1908_v49 = vadd.f32 -1.0, %v595_v42  ;;  %v614_v53 = vmul.f32 2.0, %v2248_v47  ;;  %v616_v21 = vmul.f32 %v2248_v47, %v2607_v37 }
 0x6b4   :  { %v1910_v59 = vadd.f32 -1.0, %v633_v56 }
 0x6b5   :  { %599 = vrot.lane.b32.xlu0 %v1908_v49, %s2456_s28  ;;  %v1909_v58 = vadd.f32 -1.0, %v614_v53 }
 0x6b7   :  { %618 = vrot.lane.b32.xlu1 %v1909_v58, %s2456_s28 }
 0x6b9   :  { %637 = vrot.lane.b32.xlu0 %v1910_v59, %s2456_s28 }
 0x727   :  { %v600_v60 = vpop.permute.xlu0 %599 }
 0x728   :  { %v602_v61 = vmul.f32 %v2244_v35, %v600_v60 }
 0x729   :  { %v619_v62 = vpop.permute.xlu1 %618 }
 0x72a   :  { %v621_v63 = vmul.f32 %v2248_v47, %v619_v62  ;;  %604 = vrot.lane.b32.xlu1 %v602_v61, %s2457_s29 }
 0x72b   :  { %v638_v8 = vpop.permute.xlu0 %637 }
 0x72c   :  { %v640_v10 = vmul.f32 %v2246_v41, %v638_v8  ;;  %623 = vrot.lane.b32.xlu0 %v621_v63, %s2457_s29 }
 0x72e   :  { %642 = vrot.lane.b32.xlu1 %v640_v10, %s2457_s29 }
 0x79c   :  { %v605_v19 = vpop.permute.xlu1 %604 }
 0x79d   :  { %v2687_v20 = vadd.f32 %v605_v19, %v597_v16 }
 0x79e   :  { %v624_v22 = vpop.permute.xlu0 %623 }
 0x79f   :  { %2249 = vtanh.f32 %v2687_v20  ;;  %v2691_v23 = vadd.f32 %v624_v22, %v616_v21 }
 0x7a0   :  { %v643_v25 = vpop.permute.xlu1 %642 }
 0x7a1   :  { %2251 = vtanh.f32 %v2691_v23  ;;  %v2694_v26 = vadd.f32 %v643_v25, %v635_v24 }
 0x7a3   :  { %2253 = vtanh.f32 %v2694_v26 }
 0x7ac   :  { %v2250_v27 = vpop.eup %2249 }
 0x7ad   :  { %610 = vrot.lane.b32.xlu0 %v2250_v27, %s2456_s28 }
 0x7ae   :  { %v2252_v33 = vpop.eup %2251 }
 0x7af   :  { %629 = vrot.lane.b32.xlu1 %v2252_v33, %s2456_s28 }
 0x7b0   :  { %v2254_v37 = vpop.eup %2253 }
 0x7b1   :  { %648 = vrot.lane.b32.xlu0 %v2254_v37, %s2456_s28 }
 0x81f   :  { %v611_v51 = vpop.permute.xlu0 %610 }
 0x820   :  { %v613_v54 = vmul.f32 %v2244_v35, %v611_v51  ;;  %v140_v35 = vadd.f32 %v2580_v46, %v2561_v18 }
 0x821   :  { %v630_v28 = vpop.permute.xlu1 %629 }
 0x822   :  { %v632_v17 = vmul.f32 %v2248_v47, %v630_v28  ;;  %653 = vrot.lane.b32.xlu1 %v613_v54, %s2457_s29 }
 0x823   :  { %v649_v29 = vpop.permute.xlu0 %648 }
 0x824   :  { %v651_v30 = vmul.f32 %v2246_v41, %v649_v29  ;;  %657 = vrot.lane.b32.xlu0 %v632_v17, %s2456_s28 }
 0x826   :  { %661 = vrot.lane.b32.xlu1 %v651_v30, %s2460_s0 }
 0x894   :  { %v654_v31 = vpop.permute.xlu1 %653 }
 0x896   :  { %v658_v32 = vpop.permute.xlu0 %657 }
 0x897   :  { %v664_v34 = vsel %vm340_vm1, %v654_v31, %v658_v32 }
 0x898   :  { %v662_v42 = vpop.permute.xlu1 %661 }
 0x899   :  { %v665_v49 = vsel %vm342_vm2, %v664_v34, %v662_v42 }
 0x89a   :  { %v666_v53 = vpack.c.bf16 %v665_v49, %v665_v49 }
 0x89c   :  { %1911 = vmatmul.mubr.msk.bf16.vlgmr.msra.gmra.mxu1 %vm265_vm3, %v666_v53  ;;  %2066 = vmatmul.mubr.msk.bf16.vlgmr.msra.gmra.mxu0 %vm265_vm3, %v666_v53 }
 0x89d   :  { %853 = vmatpush1.bf16.msra.mxu1 %v2491_v2  ;;  %2070 = vmatpush3.bf16.msra.mxu0 %v2610_v38 }
 0x89e   :  { %854 = vmatprep.subr.bf16.mxu1 %v2494_v3  ;;  %2071 = vmatprep.subr.bf16.mxu0 %v2458_v39 }
 0x89f   :  { %880 = vmatprep.mubr.bf16.mxu1 %v2454_v0  ;;  %2081 = vmatprep.mubr.msk.bf16.mxu0 %vm2459_vm4, %v2458_v39 }
 0x8a1   :  { %855 = vmatpush1.bf16.msra.mxu1 %v2497_v4  ;;  %2072 = vmatpush3.bf16.msra.mxu0 %v2614_v40 }
 0x8a2   :  { %856 = vmatprep.subr.bf16.mxu1 %v2499_v5  ;;  %2073 = vmatprep.subr.bf16.mxu0 %v2458_v39 }
 0x8a5   :  { %857 = vmatpush1.bf16.msra.mxu1 %v2502_v7  ;;  %2074 = vmatpush3.bf16.msra.mxu0 %v2618_v36 }
 0x8a6   :  { %858 = vmatprep.subr.bf16.mxu1 %v2508_v9  ;;  %2075 = vmatprep.subr.bf16.mxu0 %v2458_v39 }
 0x8a9   :  { %859 = vmatpush1.bf16.msra.mxu1 %v2516_v11  ;;  %2076 = vmatpush3.bf16.msra.mxu0 %v2623_v43 }
 0x8aa   :  { %860 = vmatprep.subr.bf16.mxu1 %v2519_v12  ;;  %2077 = vmatprep.subr.bf16.mxu0 %v2458_v39 }
 0x8ad   :  { %861 = vmatpush1.bf16.msra.mxu1 %v2525_v13  ;;  %2078 = vmatpush3.bf16.msra.mxu0 %v2628_v44 }
 0x8ae   :  { %862 = vmatprep.subr.bf16.mxu1 %v2530_v14  ;;  %2079 = vmatprep.subr.bf16.mxu0 %v2458_v39 }
 0x8b1   :  { %863 = vmatpush1.bf16.msra.mxu1 %v2534_v15  ;;  %2080 = vmatpush3.bf16.msra.mxu0 %v2633_v45 }
 0x8b2   :  { %1030 = vmatprep.subr.bf16.mxu1 %v2489_v1  ;;  %2085 = vmatprep.subr.bf16.mxu0 %v2458_v39 }
 0x95c   :  { %v704_v41 = vpop.f32.mrf.mxu1  ;;  %v745_v47 = vpop.f32.mrf.mxu0 }
 0x95d   :  { %v752_v56 = vadd.f32 %v704_v41, %v140_v35  ;;  %v754_v58 = vadd.f32 %v745_v47, %v2674_v6 }
 0x95e   :  { %v706_v59 = vpop.f32.mrf.mxu1  ;;  %v2067_v60 = vpop.f32.mrf.mxu0 }
 0x95f   :  { %v1913_v61 = vmul.f32 -1.442695, %v752_v56  ;;  %v1915_v62 = vmul.f32 -1.442695, %v754_v58  ;;  %v753_v63 = vadd.f32 %v706_v59, %v2597_v57 }
 0x960   :  { %v708_v8 = vpop.f32.mrf.mxu1  ;;  %v748_v10 = vpop.f32.mrf.mxu0 }
 0x961   :  { %2255 = vpow2.f32 %v1913_v61  ;;  %v1914_v16 = vmul.f32 -1.442695, %v753_v63 }
 0x962   :  { %2257 = vpow2.f32 %v1915_v62  ;;  %v709_v19 = vpop.f32.mrf.mxu1  ;;  %v2068_v21 = vpop.f32.mrf.mxu0 }
 0x963   :  { %2259 = vpow2.f32 %v1914_v16 }
 0x96e   :  { %v2256_v46 = vpop.eup %2255 }
 0x96f   :  { %v2258_v22 = vpop.eup %2257  ;;  %v764_v24 = vadd.f32 1.0, %v2256_v46 }
 0x970   :  { %v2260_v25 = vpop.eup %2259  ;;  %v766_v27 = vadd.f32 1.0, %v2258_v22 }
 0x971   :  { %2261 = vrcp.f32 %v764_v24  ;;  %v765_v33 = vadd.f32 1.0, %v2260_v25 }
 0x972   :  { %2263 = vrcp.f32 %v766_v27 }
 0x973   :  { %2265 = vrcp.f32 %v765_v33 }
 0x97e   :  { %v2262_v37 = vpop.eup %2261 }
 0x97f   :  { %v2264_v51 = vpop.eup %2263  ;;  %v773_v54 = vmul.f32 2.0, %v2262_v37  ;;  %v775_v47 = vmul.f32 %v2262_v37, %v2687_v20 }
 0x980   :  { %v2266_v28 = vpop.eup %2265  ;;  %v811_v30 = vmul.f32 2.0, %v2264_v51  ;;  %v813_v62 = vmul.f32 %v2264_v51, %v2694_v26 }
 0x981   :  { %v1916_v17 = vadd.f32 -1.0, %v773_v54  ;;  %v792_v29 = vmul.f32 2.0, %v2266_v28  ;;  %v794_v59 = vmul.f32 %v2266_v28, %v2691_v23 }
 0x982   :  { %v1918_v32 = vadd.f32 -1.0, %v811_v30 }
 0x983   :  { %777 = vrot.lane.b32.xlu0 %v1916_v17, %s2456_s28  ;;  %v1917_v31 = vadd.f32 -1.0, %v792_v29 }
 0x985   :  { %796 = vrot.lane.b32.xlu1 %v1917_v31, %s2456_s28 }
 0x987   :  { %815 = vrot.lane.b32.xlu0 %v1918_v32, %s2456_s28 }
 0x9f5   :  { %v778_v34 = vpop.permute.xlu0 %777 }
 0x9f6   :  { %v780_v42 = vmul.f32 %v2262_v37, %v778_v34 }
 0x9f7   :  { %v797_v49 = vpop.permute.xlu1 %796 }
 0x9f8   :  { %v799_v53 = vmul.f32 %v2266_v28, %v797_v49  ;;  %782 = vrot.lane.b32.xlu1 %v780_v42, %s2457_s29 }
 0x9f9   :  { %v816_v35 = vpop.permute.xlu0 %815 }
 0x9fa   :  { %v818_v41 = vmul.f32 %v2264_v51, %v816_v35  ;;  %801 = vrot.lane.b32.xlu0 %v799_v53, %s2457_s29 }
 0x9fc   :  { %820 = vrot.lane.b32.xlu1 %v818_v41, %s2457_s29 }
 0xa6a   :  { %v783_v56 = vpop.permute.xlu1 %782 }
 0xa6b   :  { %v2745_v58 = vadd.f32 %v783_v56, %v775_v47 }
 0xa6c   :  { %v802_v60 = vpop.permute.xlu0 %801 }
 0xa6d   :  { %2267 = vtanh.f32 %v2745_v58  ;;  %v2749_v61 = vadd.f32 %v802_v60, %v794_v59 }
 0xa6e   :  { %v821_v63 = vpop.permute.xlu1 %820 }
 0xa6f   :  { %2269 = vtanh.f32 %v2749_v61  ;;  %v2753_v8 = vadd.f32 %v821_v63, %v813_v62 }
 0xa71   :  { %2271 = vtanh.f32 %v2753_v8 }
 0xa7a   :  { %v2268_v20 = vpop.eup %2267 }
 0xa7b   :  { %788 = vrot.lane.b32.xlu0 %v2268_v20, %s2456_s28 }
 0xa7c   :  { %v2270_v10 = vpop.eup %2269 }
 0xa7d   :  { %807 = vrot.lane.b32.xlu1 %v2270_v10, %s2456_s28 }
 0xa7e   :  { %v2272_v23 = vpop.eup %2271 }
 0xa7f   :  { %826 = vrot.lane.b32.xlu0 %v2272_v23, %s2456_s28 }
 0xaed   :  { %v789_v16 = vpop.permute.xlu0 %788 }
 0xaee   :  { %v791_v19 = vmul.f32 %v2262_v37, %v789_v16 }
 0xaef   :  { %v808_v21 = vpop.permute.xlu1 %807 }
 0xaf0   :  { %v810_v26 = vmul.f32 %v2266_v28, %v808_v21  ;;  %831 = vrot.lane.b32.xlu1 %v791_v19, %s2457_s29 }
 0xaf1   :  { %v827_v46 = vpop.permute.xlu0 %826 }
 0xaf2   :  { %v829_v22 = vmul.f32 %v2264_v51, %v827_v46  ;;  %835 = vrot.lane.b32.xlu0 %v810_v26, %s2456_s28 }
 0xaf4   :  { %839 = vrot.lane.b32.xlu1 %v829_v22, %s2460_s0 }
 0xb62   :  { %v832_v24 = vpop.permute.xlu1 %831 }
 0xb64   :  { %v836_v25 = vpop.permute.xlu0 %835 }
 0xb65   :  { %v842_v27 = vsel %vm340_vm1, %v832_v24, %v836_v25 }
 0xb66   :  { %v840_v33 = vpop.permute.xlu1 %839 }
 0xb67   :  { %v843_v54 = vsel %vm342_vm2, %v842_v27, %v840_v33 }
 0xb68   :  { %v844_v17 = vpack.c.bf16 %v843_v54, %v843_v54 }
 0xb6a   :  { %1919 = vmatmul.mubr.msk.bf16.vlgmr.msra.gmra.mxu1 %vm265_vm3, %v844_v17  ;;  %2082 = vmatmul.mubr.msk.bf16.vlgmr.msra.gmra.mxu0 %vm265_vm3, %v844_v17 }
 0xb6b   :  { %1031 = vmatpush1.bf16.msra.mxu1 %v2491_v2  ;;  %2086 = vmatpush3.bf16.msra.mxu0 %v2610_v38  ;;  %v145_v2 = vadd.f32 %v2584_v50, %v2561_v18 }
 0xb6c   :  { %1032 = vmatprep.subr.bf16.mxu1 %v2494_v3  ;;  %2087 = vmatprep.subr.bf16.mxu0 %v2458_v39 }
 0xb6d   :  { %1058 = vmatprep.mubr.bf16.mxu1 %v2454_v0  ;;  %2097 = vmatprep.mubr.msk.bf16.mxu0 %vm2459_vm4, %v2458_v39 }
 0xb6f   :  { %1033 = vmatpush1.bf16.msra.mxu1 %v2497_v4  ;;  %2088 = vmatpush3.bf16.msra.mxu0 %v2614_v40 }
 0xb70   :  { %1034 = vmatprep.subr.bf16.mxu1 %v2499_v5  ;;  %2089 = vmatprep.subr.bf16.mxu0 %v2458_v39 }
 0xb73   :  { %1035 = vmatpush1.bf16.msra.mxu1 %v2502_v7  ;;  %2090 = vmatpush3.bf16.msra.mxu0 %v2618_v36 }
 0xb74   :  { %1036 = vmatprep.subr.bf16.mxu1 %v2508_v9  ;;  %2091 = vmatprep.subr.bf16.mxu0 %v2458_v39 }
 0xb77   :  { %1037 = vmatpush1.bf16.msra.mxu1 %v2516_v11  ;;  %2092 = vmatpush3.bf16.msra.mxu0 %v2623_v43 }
 0xb78   :  { %1038 = vmatprep.subr.bf16.mxu1 %v2519_v12  ;;  %2093 = vmatprep.subr.bf16.mxu0 %v2458_v39 }
 0xb7b   :  { %1039 = vmatpush1.bf16.msra.mxu1 %v2525_v13  ;;  %2094 = vmatpush3.bf16.msra.mxu0 %v2628_v44 }
 0xb7c   :  { %1040 = vmatprep.subr.bf16.mxu1 %v2530_v14  ;;  %2095 = vmatprep.subr.bf16.mxu0 %v2458_v39 }
 0xb7f   :  { %1041 = vmatpush1.bf16.msra.mxu1 %v2534_v15  ;;  %2096 = vmatpush3.bf16.msra.mxu0 %v2633_v45 }
 0xb80   :  { %1208 = vmatprep.subr.bf16.mxu1 %v2489_v1  ;;  %2101 = vmatprep.subr.bf16.mxu0 %v2458_v39 }
 0xc2a   :  { %v882_v3 = vpop.f32.mrf.mxu1  ;;  %v923_v4 = vpop.f32.mrf.mxu0 }
 0xc2b   :  { %v930_v5 = vadd.f32 %v882_v3, %v145_v2  ;;  %v932_v7 = vadd.f32 %v923_v4, %v2674_v6 }
 0xc2c   :  { %v884_v9 = vpop.f32.mrf.mxu1  ;;  %v2083_v11 = vpop.f32.mrf.mxu0 }
 0xc2d   :  { %v1921_v12 = vmul.f32 -1.442695, %v930_v5  ;;  %v1923_v13 = vmul.f32 -1.442695, %v932_v7  ;;  %v931_v14 = vadd.f32 %v884_v9, %v2597_v57 }
 0xc2e   :  { %v886_v15 = vpop.f32.mrf.mxu1  ;;  %v926_v37 = vpop.f32.mrf.mxu0 }
 0xc2f   :  { %2273 = vpow2.f32 %v1921_v12  ;;  %v1922_v1 = vmul.f32 -1.442695, %v931_v14  ;;  %v2825_v15 = vld [vmem:[#allocation3 + $0x90] ss:$12 sps:$4 sm:$0xff]  }
 0xc30   :  { %2275 = vpow2.f32 %v1923_v13  ;;  %v887_v51 = vpop.f32.mrf.mxu1  ;;  %v2084_v28 = vpop.f32.mrf.mxu0  ;;  %v2829_v37 = vld [vmem:[#allocation3 + $0x7c] ss:$12 sps:$4 sm:$0xff]  }
 0xc31   :  { %2277 = vpow2.f32 %v1922_v1  ;;  %v2836_v1 = vld [vmem:[#allocation3 + $0x78] ss:$12 sps:$4 sm:$0xff]   ;;  %v2844_v28 = vld [vmem:[#allocation3 + $0x60] ss:$12 sps:$4 sm:$0xff]  }
 0xc32   :  { %v2840_v51 = vld [vmem:[#allocation3 + $0x64] ss:$12 sps:$4 sm:$0xff]  }
 0xc3c   :  { %v2274_v50 = vpop.eup %2273 }
 0xc3d   :  { %v2276_v29 = vpop.eup %2275  ;;  %v942_v30 = vadd.f32 1.0, %v2274_v50  ;;  %v2848_v50 = vld [vmem:[#allocation3 + $0x4c] ss:$12 sps:$4 sm:$0xff]  }
 0xc3e   :  { %v2278_v31 = vpop.eup %2277  ;;  %v944_v32 = vadd.f32 1.0, %v2276_v29  ;;  %v2852_v29 = vld [vmem:[#allocation3 + $0x48] ss:$12 sps:$4 sm:$0xff]  }
 0xc3f   :  { %2279 = vrcp.f32 %v942_v30  ;;  %v943_v34 = vadd.f32 1.0, %v2278_v31  ;;  %v2856_v30 = vld [vmem:[#allocation3 + $0x34] ss:$12 sps:$4 sm:$0xff]   ;;  %v2860_v31 = vld [vmem:[#allocation3 + $0x30] ss:$12 sps:$4 sm:$0xff]  }
 0xc40   :  { %2281 = vrcp.f32 %v944_v32  ;;  %v2864_v32 = vld [vmem:[#allocation3 + $0x1c] ss:$12 sps:$4 sm:$0xff]  }
 0xc41   :  { %2283 = vrcp.f32 %v943_v34  ;;  %v2868_v34 = vld [vmem:[#allocation3 + $0x18] ss:$12 sps:$4 sm:$0xff]  }
 0xc4c   :  { %v2280_v42 = vpop.eup %2279 }
 0xc4d   :  { %v2282_v49 = vpop.eup %2281  ;;  %v951_v53 = vmul.f32 2.0, %v2280_v42  ;;  %v953_v19 = vmul.f32 %v2280_v42, %v2745_v58 }
 0xc4e   :  { %v2284_v35 = vpop.eup %2283  ;;  %v989_v56 = vmul.f32 2.0, %v2282_v49  ;;  %v991_v25 = vmul.f32 %v2282_v49, %v2753_v8 }
 0xc4f   :  { %v1924_v41 = vadd.f32 -1.0, %v951_v53  ;;  %v970_v47 = vmul.f32 2.0, %v2284_v35  ;;  %v972_v46 = vmul.f32 %v2284_v35, %v2749_v61 }
 0xc50   :  { %v1926_v60 = vadd.f32 -1.0, %v989_v56 }
 0xc51   :  { %955 = vrot.lane.b32.xlu0 %v1924_v41, %s2456_s28  ;;  %v1925_v59 = vadd.f32 -1.0, %v970_v47 }
 0xc53   :  { %974 = vrot.lane.b32.xlu1 %v1925_v59, %s2456_s28 }
 0xc55   :  { %993 = vrot.lane.b32.xlu0 %v1926_v60, %s2456_s28 }
 0xcc3   :  { %v956_v62 = vpop.permute.xlu0 %955 }
 0xcc4   :  { %v958_v63 = vmul.f32 %v2280_v42, %v956_v62 }
 0xcc5   :  { %v975_v20 = vpop.permute.xlu1 %974 }
 0xcc6   :  { %v977_v10 = vmul.f32 %v2284_v35, %v975_v20  ;;  %960 = vrot.lane.b32.xlu1 %v958_v63, %s2457_s29 }
 0xcc7   :  { %v994_v23 = vpop.permute.xlu0 %993 }
 0xcc8   :  { %v996_v16 = vmul.f32 %v2282_v49, %v994_v23  ;;  %979 = vrot.lane.b32.xlu0 %v977_v10, %s2457_s29 }
 0xcca   :  { %998 = vrot.lane.b32.xlu1 %v996_v16, %s2457_s29 }
 0xd38   :  { %v961_v21 = vpop.permute.xlu1 %960 }
 0xd39   :  { %v2804_v26 = vadd.f32 %v961_v21, %v953_v19 }
 0xd3a   :  { %v980_v22 = vpop.permute.xlu0 %979 }
 0xd3b   :  { %2285 = vtanh.f32 %v2804_v26  ;;  %v2808_v24 = vadd.f32 %v980_v22, %v972_v46 }
 0xd3c   :  { %v999_v27 = vpop.permute.xlu1 %998 }
 0xd3d   :  { %2287 = vtanh.f32 %v2808_v24  ;;  %v2812_v33 = vadd.f32 %v999_v27, %v991_v25 }
 0xd3f   :  { %2289 = vtanh.f32 %v2812_v33 }
 0xd48   :  { %v2286_v58 = vpop.eup %2285 }
 0xd49   :  { %966 = vrot.lane.b32.xlu0 %v2286_v58, %s2456_s28 }
 0xd4a   :  { %v2288_v54 = vpop.eup %2287 }
 0xd4b   :  { %985 = vrot.lane.b32.xlu1 %v2288_v54, %s2456_s28 }
 0xd4c   :  { %v2290_v61 = vpop.eup %2289 }
 0xd4d   :  { %1004 = vrot.lane.b32.xlu0 %v2290_v61, %s2456_s28 }
 0xdbb   :  { %v967_v17 = vpop.permute.xlu0 %966 }
 0xdbc   :  { %v969_v2 = vmul.f32 %v2280_v42, %v967_v17  ;;  %v2872_v42 = vld [vmem:[#allocation3 + $0x94] ss:$12 sps:$4 sm:$0xff]  }
 0xdbd   :  { %v986_v3 = vpop.permute.xlu1 %985 }
 0xdbe   :  { %v988_v8 = vmul.f32 %v2284_v35, %v986_v3  ;;  %1009 = vrot.lane.b32.xlu1 %v969_v2, %s2457_s29 }
 0xdbf   :  { %v1005_v4 = vpop.permute.xlu0 %1004 }
 0xdc0   :  { %v1007_v5 = vmul.f32 %v2282_v49, %v1005_v4  ;;  %1013 = vrot.lane.b32.xlu0 %v988_v8, %s2456_s28  ;;  %v148_v49 = vadd.f32 %v2593_v55, %v2561_v18 }
 0xdc2   :  { %1017 = vrot.lane.b32.xlu1 %v1007_v5, %s2460_s0 }
 0xe30   :  { %v1010_v7 = vpop.permute.xlu1 %1009 }
 0xe32   :  { %v1014_v9 = vpop.permute.xlu0 %1013 }
 0xe33   :  { %v1020_v11 = vsel %vm340_vm1, %v1010_v7, %v1014_v9 }
 0xe34   :  { %v1018_v12 = vpop.permute.xlu1 %1017 }
 0xe35   :  { %v1021_v13 = vsel %vm342_vm2, %v1020_v11, %v1018_v12 }
 0xe36   :  { %v1022_v14 = vpack.c.bf16 %v1021_v13, %v1021_v13 }
 0xe38   :  { %1927 = vmatmul.mubr.msk.bf16.vlgmr.msra.gmra.mxu1 %vm265_vm3, %v1022_v14  ;;  %2098 = vmatmul.mubr.msk.bf16.vlgmr.msra.gmra.mxu0 %vm265_vm3, %v1022_v14 }
 0xe39   :  { %1209 = vmatpush1.bf16.msra.mxu1 %v2825_v15  ;;  %2102 = vmatpush3.bf16.msra.mxu0 %v2610_v38 }
 0xe3a   :  { %1210 = vmatprep.subr.bf16.mxu1 %v2829_v37  ;;  %2103 = vmatprep.subr.bf16.mxu0 %v2458_v39 }
 0xe3b   :  { %1236 = vmatprep.mubr.bf16.mxu1 %v2454_v0  ;;  %2113 = vmatprep.mubr.msk.bf16.mxu0 %vm2459_vm4, %v2458_v39 }
 0xe3d   :  { %1211 = vmatpush1.bf16.msra.mxu1 %v2836_v1  ;;  %2104 = vmatpush3.bf16.msra.mxu0 %v2614_v40 }
 0xe3e   :  { %1212 = vmatprep.subr.bf16.mxu1 %v2840_v51  ;;  %2105 = vmatprep.subr.bf16.mxu0 %v2458_v39 }
 0xe41   :  { %1213 = vmatpush1.bf16.msra.mxu1 %v2844_v28  ;;  %2106 = vmatpush3.bf16.msra.mxu0 %v2618_v36 }
 0xe42   :  { %1214 = vmatprep.subr.bf16.mxu1 %v2848_v50  ;;  %2107 = vmatprep.subr.bf16.mxu0 %v2458_v39 }
 0xe45   :  { %1215 = vmatpush1.bf16.msra.mxu1 %v2852_v29  ;;  %2108 = vmatpush3.bf16.msra.mxu0 %v2623_v43 }
 0xe46   :  { %1216 = vmatprep.subr.bf16.mxu1 %v2856_v30  ;;  %2109 = vmatprep.subr.bf16.mxu0 %v2458_v39 }
 0xe49   :  { %1217 = vmatpush1.bf16.msra.mxu1 %v2860_v31  ;;  %2110 = vmatpush3.bf16.msra.mxu0 %v2628_v44 }
 0xe4a   :  { %1218 = vmatprep.subr.bf16.mxu1 %v2864_v32  ;;  %2111 = vmatprep.subr.bf16.mxu0 %v2458_v39 }
 0xe4d   :  { %1219 = vmatpush1.bf16.msra.mxu1 %v2868_v34  ;;  %2112 = vmatpush3.bf16.msra.mxu0 %v2633_v45 }
 0xe4e   :  { %1386 = vmatprep.subr.bf16.mxu1 %v2872_v42  ;;  %2117 = vmatprep.subr.bf16.mxu0 %v2458_v39 }
 0xef8   :  { %v1060_v53 = vpop.f32.mrf.mxu1  ;;  %v1101_v35 = vpop.f32.mrf.mxu0 }
 0xef9   :  { %v1108_v41 = vadd.f32 %v1060_v53, %v148_v49  ;;  %v1110_v47 = vadd.f32 %v1101_v35, %v2674_v6 }
 0xefa   :  { %v1062_v56 = vpop.f32.mrf.mxu1  ;;  %v2099_v59 = vpop.f32.mrf.mxu0 }
 0xefb   :  { %v1929_v60 = vmul.f32 -1.442695, %v1108_v41  ;;  %v1931_v62 = vmul.f32 -1.442695, %v1110_v47  ;;  %v1109_v63 = vadd.f32 %v1062_v56, %v2597_v57 }
 0xefc   :  { %v1064_v20 = vpop.f32.mrf.mxu1  ;;  %v1104_v10 = vpop.f32.mrf.mxu0 }
 0xefd   :  { %2291 = vpow2.f32 %v1929_v60  ;;  %v1930_v23 = vmul.f32 -1.442695, %v1109_v63 }
 0xefe   :  { %2293 = vpow2.f32 %v1931_v62  ;;  %v1065_v16 = vpop.f32.mrf.mxu1  ;;  %v2100_v19 = vpop.f32.mrf.mxu0 }
 0xeff   :  { %2295 = vpow2.f32 %v1930_v23 }
 0xf0a   :  { %v2292_v18 = vpop.eup %2291 }
 0xf0b   :  { %v2294_v55 = vpop.eup %2293  ;;  %v1120_v21 = vadd.f32 1.0, %v2292_v18 }
 0xf0c   :  { %v2296_v46 = vpop.eup %2295  ;;  %v1122_v22 = vadd.f32 1.0, %v2294_v55 }
 0xf0d   :  { %2297 = vrcp.f32 %v1120_v21  ;;  %v1121_v25 = vadd.f32 1.0, %v2296_v46 }
 0xf0e   :  { %2299 = vrcp.f32 %v1122_v22 }
 0xf0f   :  { %2301 = vrcp.f32 %v1121_v25 }
 0xf1a   :  { %v2298_v27 = vpop.eup %2297 }
 0xf1b   :  { %v2300_v58 = vpop.eup %2299  ;;  %v1129_v54 = vmul.f32 2.0, %v2298_v27  ;;  %v1131_v14 = vmul.f32 %v2298_v27, %v2804_v26 }
 0xf1c   :  { %v2302_v61 = vpop.eup %2301  ;;  %v1167_v3 = vmul.f32 2.0, %v2300_v58  ;;  %v1169_v56 = vmul.f32 %v2300_v58, %v2812_v33 }
 0xf1d   :  { %v1932_v17 = vadd.f32 -1.0, %v1129_v54  ;;  %v1148_v2 = vmul.f32 2.0, %v2302_v61  ;;  %v1150_v35 = vmul.f32 %v2302_v61, %v2808_v24 }
 0xf1e   :  { %v1934_v4 = vadd.f32 -1.0, %v1167_v3 }
 0xf1f   :  { %1133 = vrot.lane.b32.xlu0 %v1932_v17, %s2456_s28  ;;  %v1933_v8 = vadd.f32 -1.0, %v1148_v2 }
 0xf21   :  { %1152 = vrot.lane.b32.xlu1 %v1933_v8, %s2456_s28 }
 0xf23   :  { %1171 = vrot.lane.b32.xlu0 %v1934_v4, %s2456_s28 }
 0xf91   :  { %v1134_v5 = vpop.permute.xlu0 %1133 }
 0xf92   :  { %v1136_v7 = vmul.f32 %v2298_v27, %v1134_v5 }
 0xf93   :  { %v1153_v9 = vpop.permute.xlu1 %1152 }
 0xf94   :  { %v1155_v11 = vmul.f32 %v2302_v61, %v1153_v9  ;;  %1138 = vrot.lane.b32.xlu1 %v1136_v7, %s2457_s29 }
 0xf95   :  { %v1172_v12 = vpop.permute.xlu0 %1171 }
 0xf96   :  { %v1174_v13 = vmul.f32 %v2300_v58, %v1172_v12  ;;  %1157 = vrot.lane.b32.xlu0 %v1155_v11, %s2457_s29 }
 0xf98   :  { %1176 = vrot.lane.b32.xlu1 %v1174_v13, %s2457_s29 }
0x1006   :  { %v1139_v49 = vpop.permute.xlu1 %1138 }
0x1007   :  { %v2887_v53 = vadd.f32 %v1139_v49, %v1131_v14 }
0x1008   :  { %v1158_v41 = vpop.permute.xlu0 %1157 }
0x1009   :  { %2303 = vtanh.f32 %v2887_v53  ;;  %v2891_v47 = vadd.f32 %v1158_v41, %v1150_v35 }
0x100a   :  { %v1177_v59 = vpop.permute.xlu1 %1176 }
0x100b   :  { %2305 = vtanh.f32 %v2891_v47  ;;  %v2895_v60 = vadd.f32 %v1177_v59, %v1169_v56 }
0x100d   :  { %2307 = vtanh.f32 %v2895_v60 }
0x1016   :  { %v2304_v26 = vpop.eup %2303 }
0x1017   :  { %1144 = vrot.lane.b32.xlu0 %v2304_v26, %s2456_s28 }
0x1018   :  { %v2306_v62 = vpop.eup %2305 }
0x1019   :  { %1163 = vrot.lane.b32.xlu1 %v2306_v62, %s2456_s28 }
0x101a   :  { %v2308_v24 = vpop.eup %2307 }
0x101b   :  { %1182 = vrot.lane.b32.xlu0 %v2308_v24, %s2456_s28 }
0x1089   :  { %v1145_v63 = vpop.permute.xlu0 %1144 }
0x108a   :  { %v1147_v20 = vmul.f32 %v2298_v27, %v1145_v63 }
0x108b   :  { %v1164_v10 = vpop.permute.xlu1 %1163 }
0x108c   :  { %v1166_v33 = vmul.f32 %v2302_v61, %v1164_v10  ;;  %1187 = vrot.lane.b32.xlu1 %v1147_v20, %s2457_s29 }
0x108d   :  { %v1183_v23 = vpop.permute.xlu0 %1182 }
0x108e   :  { %v1185_v16 = vmul.f32 %v2300_v58, %v1183_v23  ;;  %1191 = vrot.lane.b32.xlu0 %v1166_v33, %s2456_s28 }
0x1090   :  { %1195 = vrot.lane.b32.xlu1 %v1185_v16, %s2460_s0 }
0x10fe   :  { %v1188_v19 = vpop.permute.xlu1 %1187 }
0x1100   :  { %v1192_v18 = vpop.permute.xlu0 %1191 }
0x1101   :  { %v1198_v55 = vsel %vm340_vm1, %v1188_v19, %v1192_v18 }
0x1102   :  { %v1196_v21 = vpop.permute.xlu1 %1195 }
0x1103   :  { %v1199_v46 = vsel %vm342_vm2, %v1198_v55, %v1196_v21 }
0x1104   :  { %v1200_v22 = vpack.c.bf16 %v1199_v46, %v1199_v46 }
0x1106   :  { %1935 = vmatmul.mubr.msk.bf16.vlgmr.msra.gmra.mxu1 %vm265_vm3, %v1200_v22  ;;  %2114 = vmatmul.mubr.msk.bf16.vlgmr.msra.gmra.mxu0 %vm265_vm3, %v1200_v22 }
0x1107   :  { %1387 = vmatpush1.bf16.msra.mxu1 %v2825_v15  ;;  %2118 = vmatpush3.bf16.msra.mxu0 %v2610_v38  ;;  %v2935_v38 = vld [vmem:[#allocation6 + $0x60] ss:$0 sm:$0xff] }
0x1108   :  { %1388 = vmatprep.subr.bf16.mxu1 %v2829_v37  ;;  %2119 = vmatprep.subr.bf16.mxu0 %v2458_v39 }
0x1109   :  { %1414 = vmatprep.mubr.bf16.mxu1 %v2454_v0  ;;  %2129 = vmatprep.mubr.msk.bf16.mxu0 %vm2459_vm4, %v2458_v39 }
0x110b   :  { %1389 = vmatpush1.bf16.msra.mxu1 %v2836_v1  ;;  %2120 = vmatpush3.bf16.msra.mxu0 %v2614_v40  ;;  %v153_v40 = vadd.f32 %v2935_v38, %v2582_v48 }
0x110c   :  { %1390 = vmatprep.subr.bf16.mxu1 %v2840_v51  ;;  %2121 = vmatprep.subr.bf16.mxu0 %v2458_v39 }
0x110f   :  { %1391 = vmatpush1.bf16.msra.mxu1 %v2844_v28  ;;  %2122 = vmatpush3.bf16.msra.mxu0 %v2618_v36 }
0x1110   :  { %1392 = vmatprep.subr.bf16.mxu1 %v2848_v50  ;;  %2123 = vmatprep.subr.bf16.mxu0 %v2458_v39 }
0x1113   :  { %1393 = vmatpush1.bf16.msra.mxu1 %v2852_v29  ;;  %2124 = vmatpush3.bf16.msra.mxu0 %v2623_v43 }
0x1114   :  { %1394 = vmatprep.subr.bf16.mxu1 %v2856_v30  ;;  %2125 = vmatprep.subr.bf16.mxu0 %v2458_v39 }
0x1117   :  { %1395 = vmatpush1.bf16.msra.mxu1 %v2860_v31  ;;  %2126 = vmatpush3.bf16.msra.mxu0 %v2628_v44 }
0x1118   :  { %1396 = vmatprep.subr.bf16.mxu1 %v2864_v32  ;;  %2127 = vmatprep.subr.bf16.mxu0 %v2458_v39 }
0x111b   :  { %1397 = vmatpush1.bf16.msra.mxu1 %v2868_v34  ;;  %2128 = vmatpush3.bf16.msra.mxu0 %v2633_v45 }
0x111c   :  { %1564 = vmatprep.subr.bf16.mxu1 %v2872_v42  ;;  %2133 = vmatprep.subr.bf16.mxu0 %v2458_v39 }
0x11c6   :  { %v1238_v36 = vpop.f32.mrf.mxu1  ;;  %v1279_v43 = vpop.f32.mrf.mxu0 }
0x11c7   :  { %v1286_v44 = vadd.f32 %v1238_v36, %v153_v40  ;;  %v1288_v25 = vadd.f32 %v1279_v43, %v2674_v6 }
0x11c8   :  { %v1240_v27 = vpop.f32.mrf.mxu1  ;;  %v2115_v58 = vpop.f32.mrf.mxu0 }
0x11c9   :  { %v1937_v54 = vmul.f32 -1.442695, %v1286_v44  ;;  %v1939_v61 = vmul.f32 -1.442695, %v1288_v25  ;;  %v1287_v45 = vadd.f32 %v1240_v27, %v2597_v57 }
0x11ca   :  { %v1242_v17 = vpop.f32.mrf.mxu1  ;;  %v1282_v42 = vpop.f32.mrf.mxu0 }
0x11cb   :  { %2309 = vpow2.f32 %v1937_v54  ;;  %v1938_v2 = vmul.f32 -1.442695, %v1287_v45 }
0x11cc   :  { %2311 = vpow2.f32 %v1939_v61  ;;  %v1243_v3 = vpop.f32.mrf.mxu1  ;;  %v2116_v8 = vpop.f32.mrf.mxu0 }
0x11cd   :  { %2313 = vpow2.f32 %v1938_v2  ;;  %v2970_v3 = vld [vmem:[#allocation3 + $0x98] ss:$12 sps:$4 sm:$0xff]   ;;  %v2979_v8 = vld [vmem:[#allocation3 + $0x80] ss:$12 sps:$4 sm:$0xff]  }
0x11d8   :  { %v2310_v48 = vpop.eup %2309 }
0x11d9   :  { %v2312_v4 = vpop.eup %2311  ;;  %v1298_v5 = vadd.f32 1.0, %v2310_v48 }
0x11da   :  { %v2314_v7 = vpop.eup %2313  ;;  %v1300_v9 = vadd.f32 1.0, %v2312_v4 }
0x11db   :  { %2315 = vrcp.f32 %v1298_v5  ;;  %v1299_v11 = vadd.f32 1.0, %v2314_v7 }
0x11dc   :  { %2317 = vrcp.f32 %v1300_v9 }
0x11dd   :  { %2319 = vrcp.f32 %v1299_v11 }
0x11e8   :  { %v2316_v12 = vpop.eup %2315 }
0x11e9   :  { %v2318_v13 = vpop.eup %2317  ;;  %v1307_v14 = vmul.f32 2.0, %v2316_v12  ;;  %v1309_v23 = vmul.f32 %v2316_v12, %v2887_v53 }
0x11ea   :  { %v2320_v49 = vpop.eup %2319  ;;  %v1345_v56 = vmul.f32 2.0, %v2318_v13  ;;  %v1347_v46 = vmul.f32 %v2318_v13, %v2895_v60 }
0x11eb   :  { %v1940_v35 = vadd.f32 -1.0, %v1307_v14  ;;  %v1326_v41 = vmul.f32 2.0, %v2320_v49  ;;  %v1328_v18 = vmul.f32 %v2320_v49, %v2891_v47 }
0x11ec   :  { %v1942_v26 = vadd.f32 -1.0, %v1345_v56 }
0x11ed   :  { %1311 = vrot.lane.b32.xlu0 %v1940_v35, %s2456_s28  ;;  %v1941_v59 = vadd.f32 -1.0, %v1326_v41 }
0x11ef   :  { %1330 = vrot.lane.b32.xlu1 %v1941_v59, %s2456_s28 }
0x11f1   :  { %1349 = vrot.lane.b32.xlu0 %v1942_v26, %s2456_s28 }
0x125f   :  { %v1312_v62 = vpop.permute.xlu0 %1311 }
0x1260   :  { %v1314_v24 = vmul.f32 %v2316_v12, %v1312_v62 }
0x1261   :  { %v1331_v63 = vpop.permute.xlu1 %1330 }
0x1262   :  { %v1333_v20 = vmul.f32 %v2320_v49, %v1331_v63  ;;  %1316 = vrot.lane.b32.xlu1 %v1314_v24, %s2457_s29 }
0x1263   :  { %v1350_v10 = vpop.permute.xlu0 %1349 }
0x1264   :  { %v1352_v33 = vmul.f32 %v2318_v13, %v1350_v10  ;;  %1335 = vrot.lane.b32.xlu0 %v1333_v20, %s2457_s29 }
0x1266   :  { %1354 = vrot.lane.b32.xlu1 %v1352_v33, %s2457_s29 }
0x12d4   :  { %v1317_v16 = vpop.permute.xlu1 %1316 }
0x12d5   :  { %v2948_v19 = vadd.f32 %v1317_v16, %v1309_v23 }
0x12d6   :  { %v1336_v55 = vpop.permute.xlu0 %1335 }
0x12d7   :  { %2321 = vtanh.f32 %v2948_v19  ;;  %v2952_v21 = vadd.f32 %v1336_v55, %v1328_v18 }
0x12d8   :  { %v1355_v22 = vpop.permute.xlu1 %1354 }
0x12d9   :  { %2323 = vtanh.f32 %v2952_v21  ;;  %v2956_v40 = vadd.f32 %v1355_v22, %v1347_v46 }
0x12db   :  { %2325 = vtanh.f32 %v2956_v40 }
0x12e4   :  { %v2322_v53 = vpop.eup %2321 }
0x12e5   :  { %1322 = vrot.lane.b32.xlu0 %v2322_v53, %s2456_s28 }
0x12e6   :  { %v2324_v36 = vpop.eup %2323 }
0x12e7   :  { %1341 = vrot.lane.b32.xlu1 %v2324_v36, %s2456_s28 }
0x12e8   :  { %v2326_v47 = vpop.eup %2325 }
0x12e9   :  { %1360 = vrot.lane.b32.xlu0 %v2326_v47, %s2456_s28 }
0x1357   :  { %v1323_v43 = vpop.permute.xlu0 %1322 }
0x1358   :  { %v1325_v44 = vmul.f32 %v2316_v12, %v1323_v43 }
0x1359   :  { %v1342_v25 = vpop.permute.xlu1 %1341 }
0x135a   :  { %v1344_v60 = vmul.f32 %v2320_v49, %v1342_v25  ;;  %1365 = vrot.lane.b32.xlu1 %v1325_v44, %s2457_s29 }
0x135b   :  { %v1361_v27 = vpop.permute.xlu0 %1360 }
0x135c   :  { %v1363_v58 = vmul.f32 %v2318_v13, %v1361_v27  ;;  %1369 = vrot.lane.b32.xlu0 %v1344_v60, %s2456_s28 }
0x135e   :  { %1373 = vrot.lane.b32.xlu1 %v1363_v58, %s2460_s0 }
0x13cc   :  { %v1366_v54 = vpop.permute.xlu1 %1365 }
0x13ce   :  { %v1370_v61 = vpop.permute.xlu0 %1369 }
0x13cf   :  { %v1376_v45 = vsel %vm340_vm1, %v1366_v54, %v1370_v61 }
0x13d0   :  { %v1374_v17 = vpop.permute.xlu1 %1373 }
0x13d1   :  { %v1377_v42 = vsel %vm342_vm2, %v1376_v45, %v1374_v17 }
0x13d2   :  { %v1378_v2 = vpack.c.bf16 %v1377_v42, %v1377_v42 }
0x13d4   :  { %1943 = vmatmul.mubr.msk.bf16.vlgmr.msra.gmra.mxu1 %vm265_vm3, %v1378_v2  ;;  %2130 = vmatmul.mubr.msk.bf16.vlgmr.msra.gmra.mxu0 %vm265_vm3, %v1378_v2 }
0x13d5   :  { %1565 = vmatpush1.bf16.msra.mxu1 %v2825_v15  ;;  %2134 = vmatpush3.bf16.msra.mxu0 %v2970_v3  ;;  %v2985_v15 = vld [vmem:[#allocation3 + $0x68] ss:$12 sps:$4 sm:$0xff]  }
0x13d6   :  { %1566 = vmatprep.subr.bf16.mxu1 %v2829_v37  ;;  %2135 = vmatprep.subr.bf16.mxu0 %v2458_v39  ;;  %v2997_v37 = vld [vmem:[#allocation3 + $0x38] ss:$12 sps:$4 sm:$0xff]  }
0x13d7   :  { %1592 = vmatprep.mubr.bf16.mxu1 %v2454_v0  ;;  %2145 = vmatprep.mubr.msk.bf16.mxu0 %vm2459_vm4, %v2458_v39  ;;  %v2991_v0 = vld [vmem:[#allocation3 + $0x50] ss:$12 sps:$4 sm:$0xff]  }
0x13d9   :  { %1567 = vmatpush1.bf16.msra.mxu1 %v2836_v1  ;;  %2136 = vmatpush3.bf16.msra.mxu0 %v2979_v8  ;;  %v3003_v1 = vld [vmem:[#allocation3 + $0x20] ss:$12 sps:$4 sm:$0xff]  }
0x13da   :  { %1568 = vmatprep.subr.bf16.mxu1 %v2840_v51  ;;  %2137 = vmatprep.subr.bf16.mxu0 %v2458_v39  ;;  %v156_v51 = vadd.f32 %v2935_v38, %v2588_v52 }
0x13dd   :  { %1569 = vmatpush1.bf16.msra.mxu1 %v2844_v28  ;;  %2138 = vmatpush3.bf16.msra.mxu0 %v2985_v15 }
0x13de   :  { %1570 = vmatprep.subr.bf16.mxu1 %v2848_v50  ;;  %2139 = vmatprep.subr.bf16.mxu0 %v2458_v39 }
0x13e1   :  { %1571 = vmatpush1.bf16.msra.mxu1 %v2852_v29  ;;  %2140 = vmatpush3.bf16.msra.mxu0 %v2991_v0 }
0x13e2   :  { %1572 = vmatprep.subr.bf16.mxu1 %v2856_v30  ;;  %2141 = vmatprep.subr.bf16.mxu0 %v2458_v39 }
0x13e5   :  { %1573 = vmatpush1.bf16.msra.mxu1 %v2860_v31  ;;  %2142 = vmatpush3.bf16.msra.mxu0 %v2997_v37 }
0x13e6   :  { %1574 = vmatprep.subr.bf16.mxu1 %v2864_v32  ;;  %2143 = vmatprep.subr.bf16.mxu0 %v2458_v39 }
0x13e9   :  { %1575 = vmatpush1.bf16.msra.mxu1 %v2868_v34  ;;  %2144 = vmatpush3.bf16.msra.mxu0 %v3003_v1 }
0x13ea   :  { %2149 = vmatprep.subr.bf16.mxu1 %v2458_v39  ;;  %2165 = vmatprep.subr.mxu0 %v2458_v39 }
0x1494   :  { %v1416_v28 = vpop.f32.mrf.mxu1  ;;  %v1457_v50 = vpop.f32.mrf.mxu0 }
0x1495   :  { %v1464_v29 = vadd.f32 %v1416_v28, %v156_v51  ;;  %v1466_v30 = vadd.f32 %v1457_v50, %v2674_v6 }
0x1496   :  { %v1418_v31 = vpop.f32.mrf.mxu1  ;;  %v2131_v32 = vpop.f32.mrf.mxu0 }
0x1497   :  { %v1945_v48 = vmul.f32 -1.442695, %v1464_v29  ;;  %v1947_v34 = vmul.f32 -1.442695, %v1466_v30  ;;  %v1465_v4 = vadd.f32 %v1418_v31, %v2597_v57 }
0x1498   :  { %v1420_v5 = vpop.f32.mrf.mxu1  ;;  %v1460_v7 = vpop.f32.mrf.mxu0 }
0x1499   :  { %2327 = vpow2.f32 %v1945_v48  ;;  %v1946_v9 = vmul.f32 -1.442695, %v1465_v4 }
0x149a   :  { %2329 = vpow2.f32 %v1947_v34  ;;  %v1421_v11 = vpop.f32.mrf.mxu1  ;;  %v2132_v12 = vpop.f32.mrf.mxu0 }
0x149b   :  { %2331 = vpow2.f32 %v1946_v9 }
0x14a6   :  { %v2328_v52 = vpop.eup %2327 }
0x14a7   :  { %v2330_v38 = vpop.eup %2329  ;;  %v1476_v13 = vadd.f32 1.0, %v2328_v52 }
0x14a8   :  { %v2332_v14 = vpop.eup %2331  ;;  %v1478_v49 = vadd.f32 1.0, %v2330_v38 }
0x14a9   :  { %2333 = vrcp.f32 %v1476_v13  ;;  %v1477_v35 = vadd.f32 1.0, %v2332_v14 }
0x14aa   :  { %2335 = vrcp.f32 %v1478_v49 }
0x14ab   :  { %2337 = vrcp.f32 %v1477_v35 }
0x14b6   :  { %v2334_v41 = vpop.eup %2333 }
0x14b7   :  { %v2336_v56 = vpop.eup %2335  ;;  %v1485_v59 = vmul.f32 2.0, %v2334_v41  ;;  %v1487_v22 = vmul.f32 %v2334_v41, %v2948_v19 }
0x14b8   :  { %v2338_v26 = vpop.eup %2337  ;;  %v1523_v63 = vmul.f32 2.0, %v2336_v56  ;;  %v1525_v25 = vmul.f32 %v2336_v56, %v2956_v40 }
0x14b9   :  { %v1948_v62 = vadd.f32 -1.0, %v1485_v59  ;;  %v1504_v24 = vmul.f32 2.0, %v2338_v26  ;;  %v1506_v47 = vmul.f32 %v2338_v26, %v2952_v21 }
0x14ba   :  { %v1950_v10 = vadd.f32 -1.0, %v1523_v63 }
0x14bb   :  { %1489 = vrot.lane.b32.xlu0 %v1948_v62, %s2456_s28  ;;  %v1949_v20 = vadd.f32 -1.0, %v1504_v24 }
0x14bd   :  { %1508 = vrot.lane.b32.xlu1 %v1949_v20, %s2456_s28 }
0x14bf   :  { %1527 = vrot.lane.b32.xlu0 %v1950_v10, %s2456_s28 }
0x152d   :  { %v1490_v33 = vpop.permute.xlu0 %1489 }
0x152e   :  { %v1492_v23 = vmul.f32 %v2334_v41, %v1490_v33 }
0x152f   :  { %v1509_v16 = vpop.permute.xlu1 %1508 }
0x1530   :  { %v1511_v18 = vmul.f32 %v2338_v26, %v1509_v16  ;;  %1494 = vrot.lane.b32.xlu1 %v1492_v23, %s2457_s29 }
0x1531   :  { %v1528_v55 = vpop.permute.xlu0 %1527 }
0x1532   :  { %v1530_v46 = vmul.f32 %v2336_v56, %v1528_v55  ;;  %1513 = vrot.lane.b32.xlu0 %v1511_v18, %s2457_s29 }
0x1534   :  { %1532 = vrot.lane.b32.xlu1 %v1530_v46, %s2457_s29 }
0x15a2   :  { %v1495_v53 = vpop.permute.xlu1 %1494 }
0x15a3   :  { %v1497_v36 = vadd.f32 %v1495_v53, %v1487_v22 }
0x15a4   :  { %v1514_v43 = vpop.permute.xlu0 %1513 }
0x15a5   :  { %2339 = vtanh.f32 %v1497_v36  ;;  %v3020_v44 = vadd.f32 %v1514_v43, %v1506_v47 }
0x15a6   :  { %v1533_v60 = vpop.permute.xlu1 %1532 }
0x15a7   :  { %2341 = vtanh.f32 %v3020_v44  ;;  %v3024_v27 = vadd.f32 %v1533_v60, %v1525_v25 }
0x15a9   :  { %2343 = vtanh.f32 %v3024_v27 }
0x15b2   :  { %v2340_v58 = vpop.eup %2339 }
0x15b3   :  { %1500 = vrot.lane.b32.xlu0 %v2340_v58, %s2456_s28 }
0x15b4   :  { %v2342_v19 = vpop.eup %2341 }
0x15b5   :  { %1519 = vrot.lane.b32.xlu1 %v2342_v19, %s2456_s28 }
0x15b6   :  { %v2344_v21 = vpop.eup %2343 }
0x15b7   :  { %1538 = vrot.lane.b32.xlu0 %v2344_v21, %s2456_s28 }
0x1625   :  { %v1501_v54 = vpop.permute.xlu0 %1500 }
0x1626   :  { %v1503_v61 = vmul.f32 %v2334_v41, %v1501_v54 }
0x1627   :  { %v1520_v45 = vpop.permute.xlu1 %1519 }
0x1628   :  { %v1522_v40 = vmul.f32 %v2338_v26, %v1520_v45  ;;  %1543 = vrot.lane.b32.xlu1 %v1503_v61, %s2457_s29 }
0x1629   :  { %v1539_v17 = vpop.permute.xlu0 %1538 }
0x162a   :  { %v1541_v42 = vmul.f32 %v2336_v56, %v1539_v17  ;;  %1547 = vrot.lane.b32.xlu0 %v1522_v40, %s2456_s28 }
0x162c   :  { %1551 = vrot.lane.b32.xlu1 %v1541_v42, %s2460_s0 }
0x169a   :  { %v3033_v2 = vpop.permute.xlu1 %1543 }
0x169c   :  { %v1548_v51 = vpop.permute.xlu0 %1547 }
0x169d   :  { %v1554_v28 = vsel %vm340_vm1, %v3033_v2, %v1548_v51 }
0x169e   :  { %v1552_v50 = vpop.permute.xlu1 %1551 }
0x169f   :  { %v1555_v29 = vsel %vm342_vm2, %v1554_v28, %v1552_v50  ;;  %v1775_v28 = vld [vmem:[#allocation6 + $0x48] sm:$0xff]  ;;  %v1774_v50 = vld [vmem:[#allocation6 + $0x30] sm:$0xff] }
0x16a0   :  { %v1556_v30 = vpack.c.bf16 %v1555_v29, %v1555_v29  ;;  %v1773_v29 = vld [vmem:[#allocation6 + $0x18] sm:$0xff] }
0x16a2   :  { %1951 = vmatmul.mubr.msk.bf16.vlgmr.msra.gmra.mxu1 %vm265_vm3, %v1556_v30  ;;  %2146 = vmatmul.mubr.msk.bf16.vlgmr.msra.gmra.mxu0 %vm265_vm3, %v1556_v30  ;;  %v1772_v30 = vld [vmem:[#allocation6] sm:$0xff] }
0x16a3   :  { %2150 = vmatpush3.bf16.msra.mxu1 %v2970_v3  ;;  %2161 = vmatprep.mubr.msk.bf16.mxu1 %vm2459_vm4, %v2458_v39 }
0x16a4   :  { %2151 = vmatprep.subr.bf16.mxu1 %v2458_v39  ;;  %2173 = vmatprep.mubr.msk.f32.mxu0 %vm2459_vm4, %v2458_v39 }
0x16a5   :  { %2166 = vmatpush3.msra.mxu0 %v1775_v28 }
0x16a6   :  { %2167 = vmatprep.subr.mxu0 %v2458_v39 }
0x16a7   :  { %2152 = vmatpush3.bf16.msra.mxu1 %v2979_v8  ;;  %2168 = vmatpush3.msra.mxu0 %v1774_v50 }
0x16a8   :  { %2153 = vmatprep.subr.bf16.mxu1 %v2458_v39  ;;  %2169 = vmatprep.subr.mxu0 %v2458_v39 }
0x16a9   :  { %2170 = vmatpush3.msra.mxu0 %v1773_v29 }
0x16aa   :  { %2171 = vmatprep.subr.mxu0 %v2458_v39 }
0x16ab   :  { %2154 = vmatpush3.bf16.msra.mxu1 %v2985_v15  ;;  %2172 = vmatpush3.msra.mxu0 %v1772_v30 }
0x16ac   :  { %2155 = vmatprep.subr.bf16.mxu1 %v2458_v39 }
0x16af   :  { %2156 = vmatpush3.bf16.msra.mxu1 %v2991_v0 }
0x16b0   :  { %2157 = vmatprep.subr.bf16.mxu1 %v2458_v39 }
0x16b3   :  { %2158 = vmatpush3.bf16.msra.mxu1 %v2997_v37 }
0x16b4   :  { %2159 = vmatprep.subr.bf16.mxu1 %v2458_v39 }
0x16b7   :  { %2160 = vmatpush3.bf16.msra.mxu1 %v3003_v1 }
0x1762   :  { %v1594_v3 = vpop.f32.mrf.mxu1  ;;  %v1634_v31 = vpop.f32.mrf.mxu0 }
0x1763   :  { %v1641_v8 = vadd.f32 %v1634_v31, %v2674_v6 }
0x1764   :  { %v1595_v32 = vpop.f32.mrf.mxu1  ;;  %v2147_v48 = vpop.f32.mrf.mxu0 }
0x1765   :  { %v1954_v34 = vmul.f32 -1.442695, %v1641_v8  ;;  %v1640_v15 = vadd.f32 %v1595_v32, %v2597_v57  ;;  %v1776_v48 = vld [vmem:[#allocation6 + $0x61] ss:$0 sm:$0xff] }
0x1766   :  { %v1597_v4 = vpop.f32.mrf.mxu1  ;;  %v1637_v5 = vpop.f32.mrf.mxu0 }
0x1767   :  { %2345 = vpow2.f32 %v1954_v34  ;;  %v1953_v0 = vmul.f32 -1.442695, %v1640_v15 }
0x1768   :  { %v1598_v7 = vpop.f32.mrf.mxu1  ;;  %v2148_v9 = vpop.f32.mrf.mxu0 }
0x1769   :  { %2347 = vpow2.f32 %v1953_v0 }
0x1774   :  { %v2346_v37 = vpop.eup %2345 }
0x1775   :  { %v1649_v11 = vadd.f32 1.0, %v2346_v37 }
0x1776   :  { %v2348_v12 = vpop.eup %2347 }
0x1777   :  { %2349 = vrcp.f32 %v1649_v11  ;;  %v1648_v1 = vadd.f32 1.0, %v2348_v12 }
0x1779   :  { %2351 = vrcp.f32 %v1648_v1 }
0x1784   :  { %v2350_v52 = vpop.eup %2349 }
0x1785   :  { %v1673_v38 = vmul.f32 2.0, %v2350_v52  ;;  %v1675_v26 = vmul.f32 %v2350_v52, %v3024_v27 }
0x1786   :  { %v2352_v13 = vpop.eup %2351 }
0x1787   :  { %v1956_v14 = vadd.f32 -1.0, %v1673_v38  ;;  %v1654_v49 = vmul.f32 2.0, %v2352_v13  ;;  %v1656_v63 = vmul.f32 %v2352_v13, %v3020_v44 }
0x1789   :  { %1677 = vrot.lane.b32.xlu1 %v1956_v14, %s2456_s28  ;;  %v1955_v57 = vadd.f32 -1.0, %v1654_v49 }
0x178b   :  { %1658 = vrot.lane.b32.xlu0 %v1955_v57, %s2456_s28 }
0x17fb   :  { %v1678_v35 = vpop.permute.xlu1 %1677 }
0x17fc   :  { %v1680_v41 = vmul.f32 %v2350_v52, %v1678_v35 }
0x17fd   :  { %v1659_v56 = vpop.permute.xlu0 %1658 }
0x17fe   :  { %v1661_v59 = vmul.f32 %v2352_v13, %v1659_v56  ;;  %1682 = vrot.lane.b32.xlu1 %v1680_v41, %s2457_s29 }
0x1800   :  { %1663 = vrot.lane.b32.xlu0 %v1661_v59, %s2457_s29 }
0x1870   :  { %v1683_v62 = vpop.permute.xlu1 %1682 }
0x1871   :  { %v1685_v24 = vadd.f32 %v1683_v62, %v1675_v26 }
0x1872   :  { %v1664_v20 = vpop.permute.xlu0 %1663 }
0x1873   :  { %2353 = vtanh.f32 %v1685_v24  ;;  %v1666_v10 = vadd.f32 %v1664_v20, %v1656_v63 }
0x1875   :  { %2355 = vtanh.f32 %v1666_v10 }
0x1880   :  { %v2354_v33 = vpop.eup %2353 }
0x1881   :  { %1688 = vrot.lane.b32.xlu1 %v2354_v33, %s2456_s28 }
0x1882   :  { %v2356_v23 = vpop.eup %2355 }
0x1883   :  { %1669 = vrot.lane.b32.xlu0 %v2356_v23, %s2456_s28 }
0x18f3   :  { %v1689_v16 = vpop.permute.xlu1 %1688 }
0x18f4   :  { %v1691_v18 = vmul.f32 %v2350_v52, %v1689_v16 }
0x18f5   :  { %v1670_v55 = vpop.permute.xlu0 %1669 }
0x18f6   :  { %v1672_v46 = vmul.f32 %v2352_v13, %v1670_v55  ;;  %1697 = vrot.lane.b32.xlu1 %v1691_v18, %s2460_s0 }
0x18f8   :  { %1693 = vrot.lane.b32.xlu0 %v1672_v46, %s2456_s28 }
0x1968   :  { %v1698_v53 = vpop.permute.xlu1 %1697 }
0x196a   :  { %v1694_v22 = vpop.permute.xlu0 %1693 }
0x196b   :  { %v1700_v36 = vsel %vm340_vm1, %v3033_v2, %v1694_v22 }
0x196c   :  { %v1701_v47 = vsel %vm342_vm2, %v1700_v36, %v1698_v53 }
0x196d   :  { %v1702_v43 = vpack.c.bf16 %v1701_v47, %v1701_v47 }
0x196f   :  { %2162 = vmatmul.mubr.msk.bf16.vlgmr.msra.gmra.mxu1 %vm265_vm3, %v1702_v43 }
0x1a2f   :  { %v1740_v44 = vpop.f32.mrf.mxu1 }
0x1a30   :  { %v1746_v25 = vadd.f32 %v1740_v44, %v2674_v6 }
0x1a31   :  { %v2163_v60 = vpop.f32.mrf.mxu1 }
0x1a32   :  { %v1958_v27 = vmul.f32 -1.442695, %v1746_v25 }
0x1a33   :  { %v1743_v58 = vpop.f32.mrf.mxu1 }
0x1a34   :  { %2357 = vpow2.f32 %v1958_v27 }
0x1a35   :  { %v2164_v19 = vpop.f32.mrf.mxu1 }
0x1a41   :  { %v2358_v21 = vpop.eup %2357 }
0x1a42   :  { %v1750_v54 = vadd.f32 1.0, %v2358_v21 }
0x1a44   :  { %2359 = vrcp.f32 %v1750_v54 }
0x1a51   :  { %v2360_v61 = vpop.eup %2359 }
0x1a52   :  { %v1753_v45 = vmul.f32 2.0, %v2360_v61  ;;  %v1755_v2 = vmul.f32 %v2360_v61, %v1685_v24 }
0x1a54   :  { %v1959_v40 = vadd.f32 -1.0, %v1753_v45 }
0x1a56   :  { %1757 = vrot.lane.b32.xlu0 %v1959_v40, %s2456_s28 }
0x1ac8   :  { %v1758_v17 = vpop.permute.xlu0 %1757 }
0x1ac9   :  { %v1760_v42 = vmul.f32 %v2360_v61, %v1758_v17 }
0x1acb   :  { %1762 = vrot.lane.b32.xlu1 %v1760_v42, %s2457_s29 }
0x1b3d   :  { %v1763_v51 = vpop.permute.xlu1 %1762 }
0x1b3e   :  { %v1765_v6 = vadd.f32 %v1763_v51, %v1755_v2 }
0x1b40   :  { %2361 = vtanh.f32 %v1765_v6 }
0x1b4d   :  { %v2362_v3 = vpop.eup %2361 }
0x1b4e   :  { %1768 = vrot.lane.b32.xlu0 %v2362_v3, %s2456_s28 }
0x1bc0   :  { %v1769_v31 = vpop.permute.xlu0 %1768 }
0x1bc1   :  { %v1771_v8 = vmul.f32 %v2360_v61, %v1769_v31 }
0x1bc3   :  { %1778 = vrot.lane.b32.xlu1 %v1771_v8, %s2457_s29 }
0x1c35   :  { %v1779_v32 = vpop.permute.xlu1 %1778 }
0x1c36   :  { %2174 = vmatmul.mubr.msk.f32.vlgmr.msra.gmra.mxu0 %vm340_vm1, %v1779_v32 }
0x1cf6   :  { %v1848_v34 = vpop.f32.mrf.mxu0 }
0x1cf7   :  { %v1849_v15 = vadd.f32 %v1848_v34, %v1776_v48 }
0x1cf8   :  { %v2175_v4 = vpop.f32.mrf.mxu0 }
0x1cf9   :  { %1852 = vst [vmem:[#allocation8] sm:$0xff] %v1849_v15 }
0x1cfa   :  { %2433 = shalt.err (!%p2430_p0)
}
0x1cfb   :  { %1862 = dma.vmem_to_hbm [thread:$0]  %s1860_s8, 128, %s3086_s3, [#allocation5]  }
0x1cfc   :  { %2446 = dma.done.wait [#allocation5], 128  }
0x1cfd   :  { %2447 = vsyncadd [#allocation5], 4294967168 }
0x1cfe   :  { %1866 = vsyncpa [#allocation4], 1 }
0x1cff   :  { %1867 = vsyncpa [#allocation7], 1 }
0x1d00   :  { %1868 = vsyncpa [#allocation5], 1 }

</bundles_post_ra>
